<compile_context>
chip_gen: v7x
topology: tpu7x:2x2x1
jax: 0.10.0
libtpu: 0.0.40
codegen_flags: <defaults>
</compile_context>

<pallas_src>
import functools

import jax
import jax.numpy as jnp
from jax.experimental import pallas as pl
from jax.experimental.pallas import tpu as pltpu


# ---------------------------------------------------------------------------
# Helpers
# ---------------------------------------------------------------------------

def _round_up(v, m):
    return ((v + m - 1) // m) * m


def _pad2d(a, rows, cols, dtype=None):
    dtype = a.dtype if dtype is None else dtype
    out = jnp.zeros((rows, cols), dtype)
    return out.at[: a.shape[0], : a.shape[1]].set(a.astype(dtype))


def build_dense_adjacency(edge_index, edge_weight, num_nodes):
    """A[dst, src] += w  (messages flow source -> target, aggr='add')."""
    src = edge_index[0]
    dst = edge_index[1]
    if edge_weight is None:
        edge_weight = jnp.ones((edge_index.shape[1],), jnp.float32)
    a = jnp.zeros((num_nodes, num_nodes), jnp.float32)
    return a.at[dst, src].add(edge_weight)


def build_pool_matrix(batch, num_graphs):
    """P[g, n] = 1.0 if batch[n] == g else 0.0  (global_add_pool as a matmul)."""
    return (batch[None, :] == jnp.arange(num_graphs)[:, None]).astype(jnp.float32)


# ---------------------------------------------------------------------------
# Fused Pallas kernel: all GraphConv layers + global_add_pool + fc1/relu + fc2
# ---------------------------------------------------------------------------

def fused_gnn_kernel(a_ref, x_ref, wrel_ref, wroot_ref, b_ref, p_ref,
                     fc1w_ref, fc1b_ref, fc2w_ref, fc2b_ref,
                     o_ref, h_buf, pooled_ref, *, tm):
    l = pl.program_id(0)
    i = pl.program_id(1)
    nl = pl.num_programs(0)
    ni = pl.num_programs(1)

    slot = l % 2            # layer-l input activations live in h_buf[slot] (l > 0)
    nxt = 1 - slot          # layer-l output activations go to h_buf[1 - slot]
    i_start = pl.multiple_of(i * tm, tm)

    def compute_row_tile(h_all, h_i):
        # h_all: (n_pad, d_pad) bf16 full activations; h_i: (tm, d_pad) bf16 row tile.
        # Whole aggregation for this row tile in one bf16 MXU matmul (f32 accumulation).
        agg = jnp.dot(a_ref[...], h_all, preferred_element_type=jnp.float32)
        out = (jnp.dot(agg.astype(jnp.bfloat16), wrel_ref[...],
                       preferred_element_type=jnp.float32)
               + jnp.dot(h_i, wroot_ref[...],
                         preferred_element_type=jnp.float32)
               + b_ref[...])
        out_bf = jnp.maximum(out, 0.0).astype(jnp.bfloat16)
        h_buf[nxt, pl.ds(i_start, tm), :] = out_bf

        # Accumulate global_add_pool per row tile of the last layer (no full-h re-read).
        @pl.when(l == nl - 1)
        def _pool():
            @pl.when(i == 0)
            def _zero():
                pooled_ref[...] = jnp.zeros_like(pooled_ref)
            pooled_ref[...] += jnp.dot(p_ref[...], out_bf,
                                       preferred_element_type=jnp.float32)

    # Layer 0 reads the (resident, bf16) node features directly -- no seed copy.
    @pl.when(l == 0)
    def _layer0():
        compute_row_tile(x_ref[...], x_ref[pl.ds(i_start, tm), :])

    @pl.when(l != 0)
    def _layer_n():
        compute_row_tile(h_buf[slot], h_buf[slot, pl.ds(i_start, tm), :])

    # Very last grid step: fc1(relu) + fc2 on the pooled (g_pad, d_pad) features.
    @pl.when((l == nl - 1) & (i == ni - 1))
    def _finalize():
        pooled = pooled_ref[...].astype(jnp.bfloat16)
        hid = jnp.maximum(
            jnp.dot(pooled, fc1w_ref[...],
                    preferred_element_type=jnp.float32) + fc1b_ref[...],
            0.0)
        o_ref[...] = (jnp.dot(hid.astype(jnp.bfloat16), fc2w_ref[...],
                              preferred_element_type=jnp.float32)
                      + fc2b_ref[...])


def fused_gnn_forward(a_bf16, x_pad, wrel_s, wroot_s, b_s, p_pad,
                      fc1w, fc1b, fc2w, fc2b, *, tm=256):
    num_layer, d_pad, _ = wrel_s.shape
    n_pad = a_bf16.shape[0]
    g_pad = p_pad.shape[0]
    out_pad = fc2w.shape[1]
    ni = n_pad // tm

    flops = (num_layer * (2 * n_pad * n_pad * d_pad + 4 * n_pad * d_pad * d_pad)
             + 2 * g_pad * n_pad * d_pad
             + 2 * g_pad * d_pad * d_pad
             + 2 * g_pad * d_pad * out_pad)
    bytes_accessed = (num_layer * n_pad * n_pad * 2        # A stripes (bf16), per layer
                      + n_pad * d_pad * 2                  # X (bf16, resident)
                      + num_layer * (2 * d_pad * d_pad * 2 + d_pad * 4)
                      + num_layer * g_pad * n_pad * 2      # P stripes (bf16)
                      + (d_pad * d_pad + d_pad * out_pad) * 2
                      + (d_pad + out_pad) * 4
                      + g_pad * out_pad * 4)

    kernel = functools.partial(fused_gnn_kernel, tm=tm)
    return pl.pallas_call(
        kernel,
        out_shape=jax.ShapeDtypeStruct((g_pad, out_pad), jnp.float32),
        grid_spec=pltpu.PrefetchScalarGridSpec(
            num_scalar_prefetch=0,
            grid=(num_layer, ni),
            in_specs=[
                pl.BlockSpec((tm, n_pad), lambda l, i: (i, 0)),        # A row stripe (bf16)
                pl.BlockSpec((n_pad, d_pad), lambda l, i: (0, 0)),     # X (bf16, resident)
                pl.BlockSpec((None, d_pad, d_pad), lambda l, i: (l, 0, 0)),  # W_rel[l] (bf16)
                pl.BlockSpec((None, d_pad, d_pad), lambda l, i: (l, 0, 0)),  # W_root[l] (bf16)
                pl.BlockSpec((None, 1, d_pad), lambda l, i: (l, 0, 0)),      # b[l] (f32)
                pl.BlockSpec((g_pad, tm), lambda l, i: (0, i)),        # P column stripe (bf16)
                pl.BlockSpec((d_pad, d_pad), lambda l, i: (0, 0)),     # fc1_w (bf16)
                pl.BlockSpec((1, d_pad), lambda l, i: (0, 0)),         # fc1_b (f32)
                pl.BlockSpec((d_pad, out_pad), lambda l, i: (0, 0)),   # fc2_w (bf16, lane-padded)
                pl.BlockSpec((1, out_pad), lambda l, i: (0, 0)),       # fc2_b (f32)
            ],
            out_specs=pl.BlockSpec((g_pad, out_pad), lambda l, i: (0, 0)),
            scratch_shapes=[
                pltpu.VMEM((2, n_pad, d_pad), jnp.bfloat16),   # h ping-pong (bf16, stays in VMEM)
                pltpu.VMEM((g_pad, d_pad), jnp.float32),       # pooled accumulator
            ]),
        compiler_params=pltpu.CompilerParams(
            dimension_semantics=("arbitrary", "arbitrary"),
            vmem_limit_bytes=48 * 1024 * 1024),
        cost_estimate=pl.CostEstimate(flops=flops, transcendentals=0,
                                      bytes_accessed=bytes_accessed),
    )(a_bf16, x_pad, wrel_s, wroot_s, b_s, p_pad, fc1w, fc1b, fc2w, fc2b)


# ---------------------------------------------------------------------------
# Parameters + forward wrapper (padding / stacking feeds the single kernel)
# ---------------------------------------------------------------------------

def init_params(key, node_dim, dim, num_layer):
    """Deterministic synthetic parameters; Linear weights stored as [in, out]."""
    params = {}
    keys = jax.random.split(key, 4 * num_layer + 8)
    k = iter(keys)

    def lin(kw, in_d, out_d, scale=0.1):
        return scale * jax.random.normal(kw, (in_d, out_d), jnp.float32)

    params["conv"] = [dict(
        w_rel=lin(next(k), node_dim, dim),
        w_root=lin(next(k), node_dim, dim),
        b=0.01 * jax.random.normal(next(k), (1, dim), jnp.float32))]
    for _ in range(num_layer - 1):
        params["conv"].append(dict(
            w_rel=lin(next(k), dim, dim),
            w_root=lin(next(k), dim, dim),
            b=0.01 * jax.random.normal(next(k), (1, dim), jnp.float32)))
    params["fc1_w"] = lin(next(k), dim, dim)
    params["fc1_b"] = 0.01 * jax.random.normal(next(k), (1, dim), jnp.float32)
    params["fc2_w"] = lin(next(k), dim, 1)
    params["fc2_b"] = 0.01 * jax.random.normal(next(k), (1, 1), jnp.float32)
    return params


def net_forward(params, x, edge_index, batch, edge_weight, *, num_graphs, tm=256):
    n, node_dim = x.shape
    dim = params["fc1_w"].shape[0]

    d_pad = _round_up(max(dim, node_dim, 128), 128)      # lane-dense features
    n_pad = _round_up(max(n, tm), tm)                    # tileable node count
    g_pad = _round_up(max(num_graphs, 16), 16)           # full bf16 sublane tile for P rows
    out_pad = 128                                        # lane-dense final output

    a = build_dense_adjacency(edge_index, edge_weight, n)
    p = build_pool_matrix(batch, num_graphs)

    a_bf16 = _pad2d(a, n_pad, n_pad, jnp.bfloat16)       # dominant operand in bf16
    x_pad = _pad2d(x, n_pad, d_pad, jnp.bfloat16)
    p_pad = _pad2d(p, g_pad, n_pad, jnp.bfloat16)        # 0/1 matrix: exact in bf16

    wrel_s = jnp.stack([_pad2d(layer["w_rel"], d_pad, d_pad, jnp.bfloat16)
                        for layer in params["conv"]])
    wroot_s = jnp.stack([_pad2d(layer["w_root"], d_pad, d_pad, jnp.bfloat16)
                         for layer in params["conv"]])
    b_s = jnp.stack([_pad2d(layer["b"], 1, d_pad) for layer in params["conv"]])

    fc1w = _pad2d(params["fc1_w"], d_pad, d_pad, jnp.bfloat16)
    fc1b = _pad2d(params["fc1_b"], 1, d_pad)
    fc2w = _pad2d(params["fc2_w"], d_pad, out_pad, jnp.bfloat16)
    fc2b = _pad2d(params["fc2_b"], 1, out_pad)

    out_padded = fused_gnn_forward(a_bf16, x_pad, wrel_s, wroot_s, b_s, p_pad,
                                   fc1w, fc1b, fc2w, fc2b, tm=tm)
    return out_padded[:num_graphs, :1]


def net_forward_ref(params, x, edge_index, batch, edge_weight, *, num_graphs):
    """Pure-jnp reference mirroring the kernel's bf16 matmuls (f32 accumulation)."""
    n = x.shape[0]
    a = build_dense_adjacency(edge_index, edge_weight, n).astype(jnp.bfloat16)
    p = build_pool_matrix(batch, num_graphs).astype(jnp.bfloat16)
    h = x.astype(jnp.bfloat16)
    for layer in params["conv"]:
        agg = jnp.dot(a, h, preferred_element_type=jnp.float32).astype(jnp.bfloat16)
        out = (jnp.dot(agg, layer["w_rel"].astype(jnp.bfloat16),
                       preferred_element_type=jnp.float32)
               + jnp.dot(h, layer["w_root"].astype(jnp.bfloat16),
                         preferred_element_type=jnp.float32)
               + layer["b"])
        h = jnp.maximum(out, 0.0).astype(jnp.bfloat16)
    pooled = jnp.dot(p, h, preferred_element_type=jnp.float32).astype(jnp.bfloat16)
    hid = jnp.maximum(
        jnp.dot(pooled, params["fc1_w"].astype(jnp.bfloat16),
                preferred_element_type=jnp.float32) + params["fc1_b"], 0.0)
    return (jnp.dot(hid.astype(jnp.bfloat16), params["fc2_w"].astype(jnp.bfloat16),
                    preferred_element_type=jnp.float32) + params["fc2_b"])


# ---------------------------------------------------------------------------
# Demo
# ---------------------------------------------------------------------------

if __name__ == "__main__":
    node_dim = 8      # input node feature dim
    dim = 32          # hidden dim
    num_layer = 3     # conv1 + 2 extra GraphConv layers
    num_nodes = 200   # padded to 256 -> grid (3 layers, 1 row stripe)
    num_graphs = 2
    num_edges = 800

    key = jax.random.PRNGKey(0)
    k_param, k_x, k_src, k_dst, k_w = jax.random.split(key, 5)

    params = init_params(k_param, node_dim, dim, num_layer)

    x = jax.random.normal(k_x, (num_nodes, node_dim), jnp.float32)
    src = jax.random.randint(k_src, (num_edges,), 0, num_nodes)
    dst = jax.random.randint(k_dst, (num_edges,), 0, num_nodes)
    edge_index = jnp.stack([src, dst], axis=0).astype(jnp.int32)
    edge_weight = jax.random.uniform(k_w, (num_edges,), jnp.float32, 0.1, 1.0)
    # first half of nodes -> graph 0, second half -> graph 1
    batch = jnp.concatenate([
        jnp.zeros((num_nodes // 2,), jnp.int32),
        jnp.ones((num_nodes - num_nodes // 2,), jnp.int32)])

    fwd = jax.jit(functools.partial(net_forward, num_graphs=num_graphs))
    out = jax.block_until_ready(fwd(params, x, edge_index, batch, edge_weight))

    ref = net_forward_ref(params, x, edge_index, batch, edge_weight,
                          num_graphs=num_graphs)
    assert out.shape == (num_graphs, 1), out.shape
    assert jnp.allclose(out, ref, atol=1e-2, rtol=1e-2), (out, ref)

    print("KERNEL_OK")
</pallas_src>

<mosaic_0001>
module attributes {stable_mosaic.version = 11 : i64} {
  func.func private @main(%arg0: i32) attributes {dimension_semantics = [#tpu.dimension_semantics<core_parallel>], iteration_bounds = array<i64: 2>, tpu.core_type = #tpu.core_type<sc_scalar_subcore>, window_params = []} {
    return
  }
}

module attributes {stable_mosaic.version = 11 : i64} {
  func.func private @main(%arg0: i32) attributes {dimension_semantics = [#tpu.dimension_semantics<core_parallel>], iteration_bounds = array<i64: 2>, tpu.core_type = #tpu.core_type<sc_scalar_subcore>, window_params = []} {
    return
  }
}

module attributes {stable_mosaic.version = 11 : i64} {
  func.func @fused_gnn_kernel(%arg0: i32, %arg1: i32, %arg2: memref<256x256xbf16, #tpu.memory_space<vmem>>, %arg3: memref<256x128xbf16, #tpu.memory_space<vmem>>, %arg4: memref<1x128x128xbf16, #tpu.memory_space<vmem>>, %arg5: memref<1x128x128xbf16, #tpu.memory_space<vmem>>, %arg6: memref<1x1x128xf32, #tpu.memory_space<vmem>>, %arg7: memref<16x256xbf16, #tpu.memory_space<vmem>>, %arg8: memref<128x128xbf16, #tpu.memory_space<vmem>>, %arg9: memref<1x128xf32, #tpu.memory_space<vmem>>, %arg10: memref<128x128xbf16, #tpu.memory_space<vmem>>, %arg11: memref<1x128xf32, #tpu.memory_space<vmem>>, %arg12: memref<16x128xf32, #tpu.memory_space<vmem>>, %arg13: memref<2x256x128xbf16, #tpu.memory_space<vmem>>, %arg14: memref<16x128xf32, #tpu.memory_space<vmem>>) attributes {dimension_semantics = [#tpu.dimension_semantics<arbitrary>, #tpu.dimension_semantics<arbitrary>], iteration_bounds = array<i64: 3, 1>, scalar_prefetch = 0 : i64, scratch_operands = 2 : i64, tpu.core_type = #tpu.core_type<tc>, window_params = [{transform_indices = @transform_0, window_bounds = array<i64: 256, 256>}, {pipeline_mode = #tpu.pipeline_mode<synchronous>, transform_indices = @transform_1, window_bounds = array<i64: 256, 128>}, {transform_indices = @transform_2, window_bounds = array<i64: 1, 128, 128>}, {transform_indices = @transform_3, window_bounds = array<i64: 1, 128, 128>}, {transform_indices = @transform_4, window_bounds = array<i64: 1, 1, 128>}, {transform_indices = @transform_5, window_bounds = array<i64: 16, 256>}, {pipeline_mode = #tpu.pipeline_mode<synchronous>, transform_indices = @transform_6, window_bounds = array<i64: 128, 128>}, {pipeline_mode = #tpu.pipeline_mode<synchronous>, transform_indices = @transform_7, window_bounds = array<i64: 1, 128>}, {pipeline_mode = #tpu.pipeline_mode<synchronous>, transform_indices = @transform_8, window_bounds = array<i64: 128, 128>}, {pipeline_mode = #tpu.pipeline_mode<synchronous>, transform_indices = @transform_9, window_bounds = array<i64: 1, 128>}, {pipeline_mode = #tpu.pipeline_mode<synchronous>, transform_indices = @transform_10, window_bounds = array<i64: 16, 128>}]} {
    %c2_i32 = arith.constant 2 : i32
    %c0_i32 = arith.constant 0 : i32
    %0 = arith.cmpi eq, %c2_i32, %c0_i32 : i32
    %c1_i32 = arith.constant 1 : i32
    %1 = arith.select %0, %c1_i32, %c2_i32 : i32
    %2 = arith.remsi %arg0, %1 : i32
    %c0_i32_0 = arith.constant 0 : i32
    %3 = arith.cmpi ne, %2, %c0_i32_0 : i32
    %c0_i32_1 = arith.constant 0 : i32
    %4 = arith.cmpi slt, %2, %c0_i32_1 : i32
    %c0_i32_2 = arith.constant 0 : i32
    %5 = arith.cmpi slt, %1, %c0_i32_2 : i32
    %6 = arith.xori %4, %5 : i1
    %7 = arith.andi %6, %3 : i1
    %8 = arith.addi %2, %1 : i32
    %9 = arith.select %7, %8, %2 : i32
    %c1_i32_3 = arith.constant 1 : i32
    %10 = arith.subi %c1_i32_3, %9 : i32
    %c256_i32 = arith.constant 256 : i32
    %11 = arith.muli %arg1, %c256_i32 : i32
    %12 = tpu.assume_multiple %11, 256 : i32
    %c0_i32_4 = arith.constant 0 : i32
    %13 = arith.cmpi eq, %arg0, %c0_i32_4 : i32
    %14 = arith.extui %13 : i1 to i32
    %c0_i32_5 = arith.constant 0 : i32
    %15 = arith.cmpi ne, %14, %c0_i32_5 : i32
    scf.if %15 {
      %c0 = arith.constant 0 : index
      %c0_11 = arith.constant 0 : index
      %24 = vector.load %arg3[%c0, %c0_11] : memref<256x128xbf16, #tpu.memory_space<vmem>>, vector<256x128xbf16>
      %25 = arith.index_cast %12 : i32 to index
      %c0_12 = arith.constant 0 : index
      %26 = vector.load %arg3[%25, %c0_12] : memref<256x128xbf16, #tpu.memory_space<vmem>>, vector<256x128xbf16>
      %c0_13 = arith.constant 0 : index
      %c0_14 = arith.constant 0 : index
      %27 = vector.load %arg2[%c0_13, %c0_14] : memref<256x256xbf16, #tpu.memory_space<vmem>>, vector<256x256xbf16>
      %cst = arith.constant dense<0.000000e+00> : vector<256x128xf32>
      %28 = tpu.matmul %27, %24, %cst {dimension_numbers = #tpu.dot_dimension_numbers<[1], [0], [0], [1], [0, 0, 1, 1], [], []>} : vector<256x256xbf16>, vector<256x128xbf16>, vector<256x128xf32> -> vector<256x128xf32>
      %29 = arith.truncf %28 : vector<256x128xf32> to vector<256x128xbf16>
      %c0_15 = arith.constant 0 : index
      %c0_16 = arith.constant 0 : index
      %c0_17 = arith.constant 0 : index
      %30 = vector.load %arg4[%c0_15, %c0_16, %c0_17] : memref<1x128x128xbf16, #tpu.memory_space<vmem>>, vector<1x128x128xbf16>
      %31 = vector.shape_cast %30 : vector<1x128x128xbf16> to vector<128x128xbf16>
      %cst_18 = arith.constant dense<0.000000e+00> : vector<256x128xf32>
      %32 = tpu.matmul %29, %31, %cst_18 {dimension_numbers = #tpu.dot_dimension_numbers<[1], [0], [0], [1], [0, 0, 1, 1], [], []>} : vector<256x128xbf16>, vector<128x128xbf16>, vector<256x128xf32> -> vector<256x128xf32>
      %c0_19 = arith.constant 0 : index
      %c0_20 = arith.constant 0 : index
      %c0_21 = arith.constant 0 : index
      %33 = vector.load %arg5[%c0_19, %c0_20, %c0_21] : memref<1x128x128xbf16, #tpu.memory_space<vmem>>, vector<1x128x128xbf16>
      %34 = vector.shape_cast %33 : vector<1x128x128xbf16> to vector<128x128xbf16>
      %cst_22 = arith.constant dense<0.000000e+00> : vector<256x128xf32>
      %35 = tpu.matmul %26, %34, %cst_22 {dimension_numbers = #tpu.dot_dimension_numbers<[1], [0], [0], [1], [0, 0, 1, 1], [], []>} : vector<256x128xbf16>, vector<128x128xbf16>, vector<256x128xf32> -> vector<256x128xf32>
      %36 = arith.addf %32, %35 : vector<256x128xf32>
      %c0_23 = arith.constant 0 : index
      %c0_24 = arith.constant 0 : index
      %c0_25 = arith.constant 0 : index
      %37 = vector.load %arg6[%c0_23, %c0_24, %c0_25] : memref<1x1x128xf32, #tpu.memory_space<vmem>>, vector<1x1x128xf32>
      %38 = vector.shape_cast %37 : vector<1x1x128xf32> to vector<1x128xf32>
      %39 = vector.broadcast %38 : vector<1x128xf32> to vector<256x128xf32>
      %40 = arith.addf %36, %39 : vector<256x128xf32>
      %cst_26 = arith.constant 0.000000e+00 : f32
      %41 = vector.broadcast %cst_26 : f32 to vector<256x128xf32>
      %42 = arith.maximumf %40, %41 : vector<256x128xf32>
      %43 = arith.truncf %42 : vector<256x128xf32> to vector<256x128xbf16>
      %44 = arith.index_cast %10 : i32 to index
      %45 = arith.index_cast %12 : i32 to index
      %c0_27 = arith.constant 0 : index
      %46 = vector.load %arg13[%44, %45, %c0_27] : memref<2x256x128xbf16, #tpu.memory_space<vmem>>, vector<1x256x128xbf16>
      %47 = vector.shape_cast %46 : vector<1x256x128xbf16> to vector<256x128xbf16>
      %48 = vector.shape_cast %43 : vector<256x128xbf16> to vector<1x256x128xbf16>
      tpu.vector_store %arg13[%44, %45, %c0_27], %48 {strides = array<i32>} : memref<2x256x128xbf16, #tpu.memory_space<vmem>>, vector<1x256x128xbf16>,
      %c2_i32_28 = arith.constant 2 : i32
      %49 = arith.cmpi eq, %arg0, %c2_i32_28 : i32
      %50 = arith.extui %49 : i1 to i32
      %c0_i32_29 = arith.constant 0 : i32
      %51 = arith.cmpi ne, %50, %c0_i32_29 : i32
      scf.if %51 {
        %c0_i32_30 = arith.constant 0 : i32
        %52 = arith.cmpi eq, %arg1, %c0_i32_30 : i32
        %53 = arith.extui %52 : i1 to i32
        %c0_i32_31 = arith.constant 0 : i32
        %54 = arith.cmpi ne, %53, %c0_i32_31 : i32
        scf.if %54 {
          %cst_39 = arith.constant 0.000000e+00 : f32
          %60 = vector.broadcast %cst_39 : f32 to vector<16x128xf32>
          %c0_40 = arith.constant 0 : index
          %c0_41 = arith.constant 0 : index
          %61 = vector.load %arg14[%c0_40, %c0_41] : memref<16x128xf32, #tpu.memory_space<vmem>>, vector<16x128xf32>
          tpu.vector_store %arg14[%c0_40, %c0_41], %60 {strides = array<i32>} : memref<16x128xf32, #tpu.memory_space<vmem>>, vector<16x128xf32>,
        } else {
        }
        %c0_32 = arith.constant 0 : index
        %c0_33 = arith.constant 0 : index
        %55 = vector.load %arg14[%c0_32, %c0_33] : memref<16x128xf32, #tpu.memory_space<vmem>>, vector<16x128xf32>
        %c0_34 = arith.constant 0 : index
        %c0_35 = arith.constant 0 : index
        %56 = vector.load %arg7[%c0_34, %c0_35] : memref<16x256xbf16, #tpu.memory_space<vmem>>, vector<16x256xbf16>
        %cst_36 = arith.constant dense<0.000000e+00> : vector<16x128xf32>
        %57 = tpu.matmul %56, %43, %cst_36 {dimension_numbers = #tpu.dot_dimension_numbers<[1], [0], [0], [1], [0, 0, 1, 1], [], []>} : vector<16x256xbf16>, vector<256x128xbf16>, vector<16x128xf32> -> vector<16x128xf32>
        %58 = arith.addf %55, %57 : vector<16x128xf32>
        %c0_37 = arith.constant 0 : index
        %c0_38 = arith.constant 0 : index
        %59 = vector.load %arg14[%c0_37, %c0_38] : memref<16x128xf32, #tpu.memory_space<vmem>>, vector<16x128xf32>
        tpu.vector_store %arg14[%c0_37, %c0_38], %58 {strides = array<i32>} : memref<16x128xf32, #tpu.memory_space<vmem>>, vector<16x128xf32>,
      } else {
      }
    } else {
    }
    %c0_i32_6 = arith.constant 0 : i32
    %16 = arith.cmpi ne, %arg0, %c0_i32_6 : i32
    %17 = arith.extui %16 : i1 to i32
    %c0_i32_7 = arith.constant 0 : i32
    %18 = arith.cmpi ne, %17, %c0_i32_7 : i32
    scf.if %18 {
      %24 = arith.index_cast %9 : i32 to index
      %c0 = arith.constant 0 : index
      %c0_11 = arith.constant 0 : index
      %25 = vector.load %arg13[%24, %c0, %c0_11] : memref<2x256x128xbf16, #tpu.memory_space<vmem>>, vector<1x256x128xbf16>
      %26 = vector.shape_cast %25 : vector<1x256x128xbf16> to vector<256x128xbf16>
      %27 = arith.index_cast %9 : i32 to index
      %28 = arith.index_cast %12 : i32 to index
      %c0_12 = arith.constant 0 : index
      %29 = vector.load %arg13[%27, %28, %c0_12] : memref<2x256x128xbf16, #tpu.memory_space<vmem>>, vector<1x256x128xbf16>
      %30 = vector.shape_cast %29 : vector<1x256x128xbf16> to vector<256x128xbf16>
      %c0_13 = arith.constant 0 : index
      %c0_14 = arith.constant 0 : index
      %31 = vector.load %arg2[%c0_13, %c0_14] : memref<256x256xbf16, #tpu.memory_space<vmem>>, vector<256x256xbf16>
      %cst = arith.constant dense<0.000000e+00> : vector<256x128xf32>
      %32 = tpu.matmul %31, %26, %cst {dimension_numbers = #tpu.dot_dimension_numbers<[1], [0], [0], [1], [0, 0, 1, 1], [], []>} : vector<256x256xbf16>, vector<256x128xbf16>, vector<256x128xf32> -> vector<256x128xf32>
      %33 = arith.truncf %32 : vector<256x128xf32> to vector<256x128xbf16>
      %c0_15 = arith.constant 0 : index
      %c0_16 = arith.constant 0 : index
      %c0_17 = arith.constant 0 : index
      %34 = vector.load %arg4[%c0_15, %c0_16, %c0_17] : memref<1x128x128xbf16, #tpu.memory_space<vmem>>, vector<1x128x128xbf16>
      %35 = vector.shape_cast %34 : vector<1x128x128xbf16> to vector<128x128xbf16>
      %cst_18 = arith.constant dense<0.000000e+00> : vector<256x128xf32>
      %36 = tpu.matmul %33, %35, %cst_18 {dimension_numbers = #tpu.dot_dimension_numbers<[1], [0], [0], [1], [0, 0, 1, 1], [], []>} : vector<256x128xbf16>, vector<128x128xbf16>, vector<256x128xf32> -> vector<256x128xf32>
      %c0_19 = arith.constant 0 : index
      %c0_20 = arith.constant 0 : index
      %c0_21 = arith.constant 0 : index
      %37 = vector.load %arg5[%c0_19, %c0_20, %c0_21] : memref<1x128x128xbf16, #tpu.memory_space<vmem>>, vector<1x128x128xbf16>
      %38 = vector.shape_cast %37 : vector<1x128x128xbf16> to vector<128x128xbf16>
      %cst_22 = arith.constant dense<0.000000e+00> : vector<256x128xf32>
      %39 = tpu.matmul %30, %38, %cst_22 {dimension_numbers = #tpu.dot_dimension_numbers<[1], [0], [0], [1], [0, 0, 1, 1], [], []>} : vector<256x128xbf16>, vector<128x128xbf16>, vector<256x128xf32> -> vector<256x128xf32>
      %40 = arith.addf %36, %39 : vector<256x128xf32>
      %c0_23 = arith.constant 0 : index
      %c0_24 = arith.constant 0 : index
      %c0_25 = arith.constant 0 : index
      %41 = vector.load %arg6[%c0_23, %c0_24, %c0_25] : memref<1x1x128xf32, #tpu.memory_space<vmem>>, vector<1x1x128xf32>
      %42 = vector.shape_cast %41 : vector<1x1x128xf32> to vector<1x128xf32>
      %43 = vector.broadcast %42 : vector<1x128xf32> to vector<256x128xf32>
      %44 = arith.addf %40, %43 : vector<256x128xf32>
      %cst_26 = arith.constant 0.000000e+00 : f32
      %45 = vector.broadcast %cst_26 : f32 to vector<256x128xf32>
      %46 = arith.maximumf %44, %45 : vector<256x128xf32>
      %47 = arith.truncf %46 : vector<256x128xf32> to vector<256x128xbf16>
      %48 = arith.index_cast %10 : i32 to index
      %49 = arith.index_cast %12 : i32 to index
      %c0_27 = arith.constant 0 : index
      %50 = vector.load %arg13[%48, %49, %c0_27] : memref<2x256x128xbf16, #tpu.memory_space<vmem>>, vector<1x256x128xbf16>
      %51 = vector.shape_cast %50 : vector<1x256x128xbf16> to vector<256x128xbf16>
      %52 = vector.shape_cast %47 : vector<256x128xbf16> to vector<1x256x128xbf16>
      tpu.vector_store %arg13[%48, %49, %c0_27], %52 {strides = array<i32>} : memref<2x256x128xbf16, #tpu.memory_space<vmem>>, vector<1x256x128xbf16>,
      %c2_i32_28 = arith.constant 2 : i32
      %53 = arith.cmpi eq, %arg0, %c2_i32_28 : i32
      %54 = arith.extui %53 : i1 to i32
      %c0_i32_29 = arith.constant 0 : i32
      %55 = arith.cmpi ne, %54, %c0_i32_29 : i32
      scf.if %55 {
        %c0_i32_30 = arith.constant 0 : i32
        %56 = arith.cmpi eq, %arg1, %c0_i32_30 : i32
        %57 = arith.extui %56 : i1 to i32
        %c0_i32_31 = arith.constant 0 : i32
        %58 = arith.cmpi ne, %57, %c0_i32_31 : i32
        scf.if %58 {
          %cst_39 = arith.constant 0.000000e+00 : f32
          %64 = vector.broadcast %cst_39 : f32 to vector<16x128xf32>
          %c0_40 = arith.constant 0 : index
          %c0_41 = arith.constant 0 : index
          %65 = vector.load %arg14[%c0_40, %c0_41] : memref<16x128xf32, #tpu.memory_space<vmem>>, vector<16x128xf32>
          tpu.vector_store %arg14[%c0_40, %c0_41], %64 {strides = array<i32>} : memref<16x128xf32, #tpu.memory_space<vmem>>, vector<16x128xf32>,
        } else {
        }
        %c0_32 = arith.constant 0 : index
        %c0_33 = arith.constant 0 : index
        %59 = vector.load %arg14[%c0_32, %c0_33] : memref<16x128xf32, #tpu.memory_space<vmem>>, vector<16x128xf32>
        %c0_34 = arith.constant 0 : index
        %c0_35 = arith.constant 0 : index
        %60 = vector.load %arg7[%c0_34, %c0_35] : memref<16x256xbf16, #tpu.memory_space<vmem>>, vector<16x256xbf16>
        %cst_36 = arith.constant dense<0.000000e+00> : vector<16x128xf32>
        %61 = tpu.matmul %60, %47, %cst_36 {dimension_numbers = #tpu.dot_dimension_numbers<[1], [0], [0], [1], [0, 0, 1, 1], [], []>} : vector<16x256xbf16>, vector<256x128xbf16>, vector<16x128xf32> -> vector<16x128xf32>
        %62 = arith.addf %59, %61 : vector<16x128xf32>
        %c0_37 = arith.constant 0 : index
        %c0_38 = arith.constant 0 : index
        %63 = vector.load %arg14[%c0_37, %c0_38] : memref<16x128xf32, #tpu.memory_space<vmem>>, vector<16x128xf32>
        tpu.vector_store %arg14[%c0_37, %c0_38], %62 {strides = array<i32>} : memref<16x128xf32, #tpu.memory_space<vmem>>, vector<16x128xf32>,
      } else {
      }
    } else {
    }
    %c2_i32_8 = arith.constant 2 : i32
    %19 = arith.cmpi eq, %arg0, %c2_i32_8 : i32
    %c0_i32_9 = arith.constant 0 : i32
    %20 = arith.cmpi eq, %arg1, %c0_i32_9 : i32
    %21 = arith.andi %19, %20 : i1
    %22 = arith.extui %21 : i1 to i32
    %c0_i32_10 = arith.constant 0 : i32
    %23 = arith.cmpi ne, %22, %c0_i32_10 : i32
    scf.if %23 {
      %c0 = arith.constant 0 : index
      %c0_11 = arith.constant 0 : index
      %24 = vector.load %arg14[%c0, %c0_11] : memref<16x128xf32, #tpu.memory_space<vmem>>, vector<16x128xf32>
      %25 = arith.truncf %24 : vector<16x128xf32> to vector<16x128xbf16>
      %c0_12 = arith.constant 0 : index
      %c0_13 = arith.constant 0 : index
      %26 = vector.load %arg8[%c0_12, %c0_13] : memref<128x128xbf16, #tpu.memory_space<vmem>>, vector<128x128xbf16>
      %cst = arith.constant dense<0.000000e+00> : vector<16x128xf32>
      %27 = tpu.matmul %25, %26, %cst {dimension_numbers = #tpu.dot_dimension_numbers<[1], [0], [0], [1], [0, 0, 1, 1], [], []>} : vector<16x128xbf16>, vector<128x128xbf16>, vector<16x128xf32> -> vector<16x128xf32>
      %c0_14 = arith.constant 0 : index
      %c0_15 = arith.constant 0 : index
      %28 = vector.load %arg9[%c0_14, %c0_15] : memref<1x128xf32, #tpu.memory_space<vmem>>, vector<1x128xf32>
      %29 = vector.broadcast %28 : vector<1x128xf32> to vector<16x128xf32>
      %30 = arith.addf %27, %29 : vector<16x128xf32>
      %cst_16 = arith.constant 0.000000e+00 : f32
      %31 = vector.broadcast %cst_16 : f32 to vector<16x128xf32>
      %32 = arith.maximumf %30, %31 : vector<16x128xf32>
      %33 = arith.truncf %32 : vector<16x128xf32> to vector<16x128xbf16>
      %c0_17 = arith.constant 0 : index
      %c0_18 = arith.constant 0 : index
      %34 = vector.load %arg10[%c0_17, %c0_18] : memref<128x128xbf16, #tpu.memory_space<vmem>>, vector<128x128xbf16>
      %cst_19 = arith.constant dense<0.000000e+00> : vector<16x128xf32>
      %35 = tpu.matmul %33, %34, %cst_19 {dimension_numbers = #tpu.dot_dimension_numbers<[1], [0], [0], [1], [0, 0, 1, 1], [], []>} : vector<16x128xbf16>, vector<128x128xbf16>, vector<16x128xf32> -> vector<16x128xf32>
      %c0_20 = arith.constant 0 : index
      %c0_21 = arith.constant 0 : index
      %36 = vector.load %arg11[%c0_20, %c0_21] : memref<1x128xf32, #tpu.memory_space<vmem>>, vector<1x128xf32>
      %37 = vector.broadcast %36 : vector<1x128xf32> to vector<16x128xf32>
      %38 = arith.addf %35, %37 : vector<16x128xf32>
      %c0_22 = arith.constant 0 : index
      %c0_23 = arith.constant 0 : index
      %39 = vector.load %arg12[%c0_22, %c0_23] : memref<16x128xf32, #tpu.memory_space<vmem>>, vector<16x128xf32>
      tpu.vector_store %arg12[%c0_22, %c0_23], %38 {strides = array<i32>} : memref<16x128xf32, #tpu.memory_space<vmem>>, vector<16x128xf32>,
    } else {
    }
    return
  }
  func.func @transform_0(%arg0: i32, %arg1: i32) -> (i32, i32) {
    %c0_i32 = arith.constant 0 : i32
    %c0_i32_0 = arith.constant 0 : i32
    return %arg1, %c0_i32 : i32, i32
  }
  func.func @transform_1(%arg0: i32, %arg1: i32) -> (i32, i32) {
    %c0_i32 = arith.constant 0 : i32
    %c0_i32_0 = arith.constant 0 : i32
    %c0_i32_1 = arith.constant 0 : i32
    return %c0_i32, %c0_i32_0 : i32, i32
  }
  func.func @transform_2(%arg0: i32, %arg1: i32) -> (i32, i32, i32) {
    %c0_i32 = arith.constant 0 : i32
    %c0_i32_0 = arith.constant 0 : i32
    %c0_i32_1 = arith.constant 0 : i32
    return %arg0, %c0_i32, %c0_i32_0 : i32, i32, i32
  }
  func.func @transform_3(%arg0: i32, %arg1: i32) -> (i32, i32, i32) {
    %c0_i32 = arith.constant 0 : i32
    %c0_i32_0 = arith.constant 0 : i32
    %c0_i32_1 = arith.constant 0 : i32
    return %arg0, %c0_i32, %c0_i32_0 : i32, i32, i32
  }
  func.func @transform_4(%arg0: i32, %arg1: i32) -> (i32, i32, i32) {
    %c0_i32 = arith.constant 0 : i32
    %c0_i32_0 = arith.constant 0 : i32
    %c0_i32_1 = arith.constant 0 : i32
    return %arg0, %c0_i32, %c0_i32_0 : i32, i32, i32
  }
  func.func @transform_5(%arg0: i32, %arg1: i32) -> (i32, i32) {
    %c0_i32 = arith.constant 0 : i32
    %c0_i32_0 = arith.constant 0 : i32
    return %c0_i32, %arg1 : i32, i32
  }
  func.func @transform_6(%arg0: i32, %arg1: i32) -> (i32, i32) {
    %c0_i32 = arith.constant 0 : i32
    %c0_i32_0 = arith.constant 0 : i32
    %c0_i32_1 = arith.constant 0 : i32
    return %c0_i32, %c0_i32_0 : i32, i32
  }
  func.func @transform_7(%arg0: i32, %arg1: i32) -> (i32, i32) {
    %c0_i32 = arith.constant 0 : i32
    %c0_i32_0 = arith.constant 0 : i32
    %c0_i32_1 = arith.constant 0 : i32
    return %c0_i32, %c0_i32_0 : i32, i32
  }
  func.func @transform_8(%arg0: i32, %arg1: i32) -> (i32, i32) {
    %c0_i32 = arith.constant 0 : i32
    %c0_i32_0 = arith.constant 0 : i32
    %c0_i32_1 = arith.constant 0 : i32
    return %c0_i32, %c0_i32_0 : i32, i32
  }
  func.func @transform_9(%arg0: i32, %arg1: i32) -> (i32, i32) {
    %c0_i32 = arith.constant 0 : i32
    %c0_i32_0 = arith.constant 0 : i32
    %c0_i32_1 = arith.constant 0 : i32
    return %c0_i32, %c0_i32_0 : i32, i32
  }
  func.func @transform_10(%arg0: i32, %arg1: i32) -> (i32, i32) {
    %c0_i32 = arith.constant 0 : i32
    %c0_i32_0 = arith.constant 0 : i32
    %c0_i32_1 = arith.constant 0 : i32
    return %c0_i32, %c0_i32_0 : i32, i32
  }
}

</mosaic_0001>

<bundles_post_ra>
// kernel: net_forward.1
= control target key start
LH: loop header
LB: loop body
LE: loop exit
PB: predicated region body
PF: predicated region fallthrough
CT: control target
= control target key end

     0   :  { %s4250_s13 = smov 0   ;;  %s4252_s14 = smov 0   ;;  %s4952_s0 = inlined_call_operand.vmem [shape: bf16[256,256], index: 0, kind: input, shape index: {}]   ;;  %s4953_s1 = inlined_call_operand.vmem [shape: bf16[256,128], index: 1, kind: input, shape index: {}]   ;;  %s4954_s2 = inlined_call_operand.vmem [shape: bf16[3,128,128], index: 2, kind: input, shape index: {}]   ;;  %s4955_s3 = inlined_call_operand.vmem [shape: bf16[3,128,128], index: 3, kind: input, shape index: {}]   ;;  %s4956_s4 = inlined_call_operand.vmem [shape: f32[3,1,128], index: 4, kind: input, shape index: {}]   ;;  %s4957_s5 = inlined_call_operand.vmem [shape: bf16[16,256], index: 5, kind: input, shape index: {}]   ;;  %s4958_s6 = inlined_call_operand.vmem [shape: bf16[128,128], index: 6, kind: input, shape index: {}]   ;;  %s4959_s7 = inlined_call_operand.vmem [shape: f32[1,128], index: 7, kind: input, shape index: {}]   ;;  %s4960_s8 = inlined_call_operand.vmem [shape: bf16[128,128], index: 8, kind: input, shape index: {}]   ;;  %s4961_s9 = inlined_call_operand.vmem [shape: f32[1,128], index: 9, kind: input, shape index: {}]   ;;  %s4962_s10 = inlined_call_operand.vmem [shape: f32[16,128], index: 10, kind: output, shape index: {}]  }
   0x1   :  { %s4254_s15 = smov 0  }
   0x2 LB: > { %s32_s16 = sadd.s32 1, %s4187_s14  ;;  %p3100_p0 = scmp.ge.s32.totalorder %s4191_s15, 1  ;;  %s4191_s15 = sphi %s4254_s15, %s20_s15   ;;  %s4187_s14 = sphi %s4252_s14, %s4964_s14   ;;  %s4183_s13 = sphi %s4250_s13, %s4963_s13  }
   0x3   : > { %p34_p1 = scmp.ge.s32.totalorder %s32_s16, 3  ;;  %p360_p2 = scmp.lt.s32.totalorder %s4191_s15, 4 }
   0x5   : > { %s4966_s16 = smov (%p34_p1, %s32_s16), 0  ;;  %p361_p3 = pnand %p3100_p0, %p360_p2 }
   0x6   : > { %p419_p4 = scmp.lt.s32.totalorder (!%p361_p3), %s4183_s13, 2  ;;  %s440_s17 = ssub.s32 (!%p361_p3), 0, %s4183_s13 }
   0x7   : > { %364 = sbr.rel (%p361_p3) target bundleno = 2131 (0x853), region = 60  ;;  %p439_p5 = scmp.lt.s32.totalorder (!%p361_p3), %s4183_s13, 0 }
   0x8   : > { %s3105_s19 = smin.u32 (!%p361_p3), %s4183_s13, %s440_s17  ;;  %p3108_p7 = scmp.ne.s32.totalorder (!%p361_p3), %s4183_s13, 0 }
   0x9   : > { %s442_s30 = sand.u32 (!%p361_p3), 1, %s3105_s19  }
   0xa   : > { %s443_s11 = ssub.s32 (!%p361_p3), 0, %s442_s30 }
   0xe   : > { %s420_s18 = scalar_select %p419_p4, %s4183_s13, 2 }
   0xf   : > { %s4968_s11 = smov (!%p439_p5, %s443_s11), %s442_s30  ;;  %456 = sbr.rel (%p3108_p7) target bundleno = 835 (0x343), region = 64 }
  0x10   : > { %s3274_s20 = sshll.u32 %s420_s18, 6  ;;  %s4278_s23 = scalar_lea.vmem %s4956_s4, %s420_s18  ;;  %v3987_v0 = vld [vmem:[%s4953_s1 + $0x40] sm:$0xff] (!%p3108_p7)   ;;  %v3989_v2 = vld [vmem:[%s4953_s1 + $0x48] sm:$0xff] (!%p3108_p7)   ;;  %v3991_v4 = vld [vmem:[%s4953_s1 + $0x50] sm:$0xff] (!%p3108_p7)  }
  0x11   : > { %s4283_s26 = scalar_lea.vmem %s4954_s2, %s3274_s20  ;;  %s4288_s29 = scalar_lea.vmem %s4955_s3, %s3274_s20  ;;  %v3988_v1 = vld [vmem:[%s4953_s1] sm:$0xff] (!%p3108_p7)   ;;  %3281 = vmatprep.subr.bf16.mxu0 (!%p3108_p7), %v3987_v0  ;;  %v3990_v3 = vld [vmem:[%s4953_s1 + $0x8] sm:$0xff] (!%p3108_p7)   ;;  %v3992_v5 = vld [vmem:[%s4953_s1 + $0x10] sm:$0xff] (!%p3108_p7)  }
  0x12   : > { %p3107_p6 = scmp.lt.s32.totalorder %s4968_s11, 0  ;;  %s449_s12 = sadd.s32 2, %s4968_s11  ;;  %3282 = vmatpush3.bf16.msra.mxu0 (!%p3108_p7), %v3988_v1  ;;  %v3993_v6 = vld [vmem:[%s4953_s1 + $0x58] sm:$0xff] (!%p3108_p7)   ;;  %v3995_v8 = vld [vmem:[%s4953_s1 + $0x60] sm:$0xff] (!%p3108_p7)   ;;  %v3997_v10 = vld [vmem:[%s4953_s1 + $0x68] sm:$0xff] (!%p3108_p7)  }
  0x13   : > { %3283 = vmatprep.subr.bf16.mxu0 (!%p3108_p7), %v3989_v2  ;;  %v3994_v7 = vld [vmem:[%s4953_s1 + $0x18] sm:$0xff] (!%p3108_p7)   ;;  %v3996_v9 = vld [vmem:[%s4953_s1 + $0x20] sm:$0xff] (!%p3108_p7)   ;;  %v3998_v12 = vld [vmem:[%s4953_s1 + $0x28] sm:$0xff] (!%p3108_p7)   ;;  %p3192_p8 = scmp.ne.s32.totalorder (!%p3108_p7), %s4183_s13, 2 }
  0x14   : > { %s4970_s12 = smov (!%p3107_p6, %s449_s12), %s4968_s11  ;;  %v4005_v11 = vld [vmem:[%s4952_s0 + $0x4] ss:$8 sps:$4 sm:$0xff] (!%p3108_p7)   ;;  %v3999_v13 = vld [vmem:[%s4953_s1 + $0x70] sm:$0xff] (!%p3108_p7)   ;;  %v4001_v15 = vld [vmem:[%s4953_s1 + $0x78] sm:$0xff] (!%p3108_p7)  }
  0x15   : > { %s451_s17 = ssub.s32 1, %s4970_s12  ;;  %845 = vmatprep.mubr.bf16.mxu0 (!%p3108_p7), %v4005_v11  ;;  %v4000_v14 = vld [vmem:[%s4953_s1 + $0x30] sm:$0xff] (!%p3108_p7)   ;;  %v4002_v16 = vld [vmem:[%s4953_s1 + $0x38] sm:$0xff] (!%p3108_p7)   ;;  %v4003_v17 = vld [vmem:[%s4952_s0] ss:$8 sps:$4 sm:$0xff] (!%p3108_p7)  }
  0x16   : > { %3284 = vmatpush3.bf16.msra.mxu0 %v3990_v3  ;;  %v4006_v18 = vld [vmem:[%s4952_s0 + $0x14] ss:$8 sps:$4 sm:$0xff]   ;;  %v4008_v19 = vld [vmem:[%s4952_s0 + $0x10] ss:$8 sps:$4 sm:$0xff]   ;;  %v4009_v20 = vld [vmem:[%s4952_s0 + $0x24] ss:$8 sps:$4 sm:$0xff]  }
  0x17   : > { %3285 = vmatprep.subr.bf16.mxu0 %v3991_v4  ;;  %v4051_v21 = vld [vmem:[%s4288_s29] sm:$0xff]   ;;  %v4052_v22 = vld [vmem:[%s4288_s29 + $0x8] sm:$0xff]   ;;  %v4053_v23 = vld [vmem:[%s4288_s29 + $0x10] sm:$0xff]   ;;  %s3276_s27 = sshll.u32 %s451_s17, 7 }
  0x18   : > { %3663 = vmatprep.subr.bf16.mxu1 %v4051_v21  ;;  %v4011_v24 = vld [vmem:[%s4952_s0 + $0x20] ss:$8 sps:$4 sm:$0xff]   ;;  %v4054_v25 = vld [vmem:[%s4288_s29 + $0x18] sm:$0xff]   ;;  %v4015_v31 = vld [vmem:[%s4952_s0 + $0x44] ss:$8 sps:$4 sm:$0xff]   ;;  %s4515_s28 = scalar_lea.vmem [#allocation2], %s3276_s27 }
  0x19   : > { %3664 = vmatpush3.bf16.msra.mxu1 %v4051_v21  ;;  %v4059_v26 = vld [vmem:[%s4953_s1] sm:$0xff]   ;;  %v4012_v27 = vld [vmem:[%s4952_s0 + $0x34] ss:$8 sps:$4 sm:$0xff]   ;;  %v4014_v29 = vld [vmem:[%s4952_s0 + $0x30] ss:$8 sps:$4 sm:$0xff]  }
  0x1a   : > { %3286 = vmatpush3.bf16.msra.mxu0 %v3992_v5  ;;  %3665 = vmatprep.subr.bf16.mxu1 %v4052_v22  ;;  %v4055_v28 = vld [vmem:[%s4288_s29 + $0x20] sm:$0xff]   ;;  %v4056_v30 = vld [vmem:[%s4288_s29 + $0x28] sm:$0xff]   ;;  %v4057_v32 = vld [vmem:[%s4288_s29 + $0x30] sm:$0xff]  }
  0x1b   : > { %3287 = vmatprep.subr.bf16.mxu0 %v3993_v6  ;;  %3679 = vmatprep.mubr.bf16.mxu1 %v4059_v26  ;;  %v4017_v33 = vld [vmem:[%s4952_s0 + $0x40] ss:$8 sps:$4 sm:$0xff]   ;;  %v4058_v34 = vld [vmem:[%s4288_s29 + $0x38] sm:$0xff]   ;;  %v4061_v38 = vld [vmem:[%s4953_s1 + $0x10] sm:$0xff]  }
  0x1c   : > { %v4018_v35 = vld [vmem:[%s4952_s0 + $0x54] ss:$8 sps:$4 sm:$0xff]   ;;  %v4069_v36 = vld [vmem:[%s4283_s26] sm:$0xff]   ;;  %v4060_v37 = vld [vmem:[%s4953_s1 + $0x8] sm:$0xff]  }
  0x1d   : > { %3666 = vmatpush3.bf16.msra.mxu1 %v4052_v22  ;;  %v4020_v39 = vld [vmem:[%s4952_s0 + $0x50] ss:$8 sps:$4 sm:$0xff]   ;;  %v4070_v40 = vld [vmem:[%s4283_s26 + $0x8] sm:$0xff]   ;;  %v4063_v44 = vld [vmem:[%s4953_s1 + $0x20] sm:$0xff]  }
  0x1e   : > { %3288 = vmatpush3.bf16.msra.mxu0 %v3994_v7  ;;  %3667 = vmatprep.subr.bf16.mxu1 %v4053_v23  ;;  %v4021_v41 = vld [vmem:[%s4952_s0 + $0x64] ss:$8 sps:$4 sm:$0xff]   ;;  %v4073_v42 = vld [vmem:[%s4283_s26 + $0x10] sm:$0xff]   ;;  %v4062_v43 = vld [vmem:[%s4953_s1 + $0x18] sm:$0xff]  }
  0x1f   : > { %3289 = vmatprep.subr.bf16.mxu0 %v3995_v8  ;;  %v4023_v45 = vld [vmem:[%s4952_s0 + $0x60] ss:$8 sps:$4 sm:$0xff]   ;;  %v4074_v46 = vld [vmem:[%s4283_s26 + $0x18] sm:$0xff]   ;;  %v4065_v49 = vld [vmem:[%s4953_s1 + $0x30] sm:$0xff]  }
  0x20   : > { %v4024_v47 = vld [vmem:[%s4952_s0 + $0x74] ss:$8 sps:$4 sm:$0xff]   ;;  %v4064_v48 = vld [vmem:[%s4953_s1 + $0x28] sm:$0xff]   ;;  %v4026_v50 = vld [vmem:[%s4952_s0 + $0x70] ss:$8 sps:$4 sm:$0xff]  }
  0x21   : > { %3668 = vmatpush3.bf16.msra.mxu1 %v4053_v23  ;;  %v4027_v51 = vld [vmem:[%s4952_s0 + $0x84] ss:$8 sps:$4 sm:$0xff]   ;;  %v4066_v52 = vld [vmem:[%s4953_s1 + $0x38] sm:$0xff]   ;;  %v4029_v54 = vld [vmem:[%s4952_s0 + $0x80] ss:$8 sps:$4 sm:$0xff]  }
  0x22   : > { %3290 = vmatpush3.bf16.msra.mxu0 %v3996_v9  ;;  %3669 = vmatprep.subr.bf16.mxu1 %v4054_v25  ;;  %v4067_v53 = vld [vmem:[%s4953_s1 + $0x40] sm:$0xff]   ;;  %v4030_v55 = vld [vmem:[%s4952_s0 + $0x94] ss:$8 sps:$4 sm:$0xff]   ;;  %v4068_v56 = vld [vmem:[%s4953_s1 + $0x48] sm:$0xff]  }
  0x23   : > { %3291 = vmatprep.subr.bf16.mxu0 %v3997_v10  ;;  %v4071_v57 = vld [vmem:[%s4953_s1 + $0x50] sm:$0xff]   ;;  %v4033_v59 = vld [vmem:[%s4952_s0 + $0xa4] ss:$8 sps:$4 sm:$0xff]   ;;  %v4072_v60 = vld [vmem:[%s4953_s1 + $0x58] sm:$0xff]  }
  0x24   : > { %v4032_v58 = vld [vmem:[%s4952_s0 + $0x90] ss:$8 sps:$4 sm:$0xff]   ;;  %v4075_v61 = vld [vmem:[%s4953_s1 + $0x60] sm:$0xff]   ;;  %v4036_v63 = vld [vmem:[%s4952_s0 + $0xb4] ss:$8 sps:$4 sm:$0xff]  }
  0x25   : > { %3670 = vmatpush3.bf16.msra.mxu1 %v4054_v25  ;;  %v4035_v62 = vld [vmem:[%s4952_s0 + $0xa0] ss:$8 sps:$4 sm:$0xff]   ;;  %v4038_v2 = vld [vmem:[%s4952_s0 + $0xb0] ss:$8 sps:$4 sm:$0xff]   ;;  %v4039_v3 = vld [vmem:[%s4952_s0 + $0xc4] ss:$8 sps:$4 sm:$0xff]  }
  0x26   : > { %3292 = vmatpush3.bf16.msra.mxu0 %v3998_v12  ;;  %3671 = vmatprep.subr.bf16.mxu1 %v4055_v28  ;;  %v4077_v0 = vld [vmem:[%s4283_s26 + $0x20] sm:$0xff]   ;;  %v4076_v1 = vld [vmem:[%s4953_s1 + $0x68] sm:$0xff]   ;;  %v4079_v5 = vld [vmem:[%s4953_s1 + $0x70] sm:$0xff]  }
  0x27   : > { %3293 = vmatprep.subr.bf16.mxu0 %v3999_v13  ;;  %v4078_v4 = vld [vmem:[%s4283_s26 + $0x28] sm:$0xff]   ;;  %v4081_v6 = vld [vmem:[%s4283_s26 + $0x30] sm:$0xff]   ;;  %v4080_v7 = vld [vmem:[%s4953_s1 + $0x78] sm:$0xff]  }
  0x28   : > { %v4041_v8 = vld [vmem:[%s4952_s0 + $0xc0] ss:$8 sps:$4 sm:$0xff]   ;;  %v4042_v9 = vld [vmem:[%s4952_s0 + $0xd4] ss:$8 sps:$4 sm:$0xff]   ;;  %v4044_v11 = vld [vmem:[%s4952_s0 + $0xd0] ss:$8 sps:$4 sm:$0xff]  }
  0x29   : > { %3672 = vmatpush3.bf16.msra.mxu1 %v4055_v28  ;;  %v4082_v10 = vld [vmem:[%s4283_s26 + $0x38] sm:$0xff]   ;;  %v4045_v12 = vld [vmem:[%s4952_s0 + $0xe4] ss:$8 sps:$4 sm:$0xff]   ;;  %v4047_v13 = vld [vmem:[%s4952_s0 + $0xe0] ss:$8 sps:$4 sm:$0xff]  }
  0x2a   : > { %3294 = vmatpush3.bf16.msra.mxu0 %v4000_v14  ;;  %3673 = vmatprep.subr.bf16.mxu1 %v4056_v30  ;;  %v4048_v14 = vld [vmem:[%s4952_s0 + $0xf4] ss:$8 sps:$4 sm:$0xff]  }
  0x2b   : > { %3295 = vmatprep.subr.bf16.mxu0 %v4001_v15  ;;  %v4050_v15 = vld [vmem:[%s4952_s0 + $0xf0] ss:$8 sps:$4 sm:$0xff]  }
  0x2d   : > { %3674 = vmatpush3.bf16.msra.mxu1 %v4056_v30 }
  0x2e   : > { %3296 = vmatpush3.bf16.msra.mxu0 %v4002_v16  ;;  %3675 = vmatprep.subr.bf16.mxu1 %v4057_v32 }
  0x31   : > { %846 = vmatmul.mubr.bf16.vlgmr.msra.gmra.mrb[0].mxu0 %v4003_v17  ;;  %3676 = vmatpush3.bf16.msra.mxu1 %v4057_v32 }
  0x32   : > { %853 = vmatprep.mubr.bf16.mxu0 %v4006_v18  ;;  %3677 = vmatprep.subr.bf16.mxu1 %v4058_v34 }
  0x35   : > { %3678 = vmatpush3.bf16.msra.mxu1 %v4058_v34 }
  0x36   : > { %3711 = vmatprep.subr.bf16.mxu1 %v4069_v36 }
  0x38   : > { %3680 = vmatmul.mubr.bf16.vlgmr.msra.gmra.mrb[0].mxu1 %v4060_v37 }
  0x39   : > { %854 = vmatmul.mubr.bf16.gmra.mrb[4].mxu0 %v4008_v19  ;;  %3683 = vmatprep.mubr.bf16.mxu1 %v4061_v38 }
  0x3a   : > { %861 = vmatprep.mubr.bf16.mxu0 %v4009_v20  ;;  %3712 = vmatpush3.bf16.msra.mxu1 %v4069_v36 }
  0x3b   : > { %3713 = vmatprep.subr.bf16.mxu1 %v4070_v40 }
  0x3e   : > { %3714 = vmatpush3.bf16.msra.mxu1 %v4070_v40 }
  0x3f   : > { %3715 = vmatprep.subr.bf16.mxu1 %v4073_v42 }
  0x40   : > { %3684 = vmatmul.mubr.bf16.gmra.mrb[4].mxu1 %v4062_v43 }
  0x41   : > { %862 = vmatmul.mubr.bf16.gmra.mrb[8].mxu0 %v4011_v24  ;;  %3687 = vmatprep.mubr.bf16.mxu1 %v4063_v44 }
  0x42   : > { %869 = vmatprep.mubr.bf16.mxu0 %v4012_v27  ;;  %3716 = vmatpush3.bf16.msra.mxu1 %v4073_v42 }
  0x43   : > { %3717 = vmatprep.subr.bf16.mxu1 %v4074_v46 }
  0x46   : > { %3718 = vmatpush3.bf16.msra.mxu1 %v4074_v46 }
  0x47   : > { %3719 = vmatprep.subr.bf16.mxu1 %v4077_v0 }
  0x48   : > { %3688 = vmatmul.mubr.bf16.gmra.mrb[8].mxu1 %v4064_v48 }
  0x49   : > { %870 = vmatmul.mubr.bf16.gmra.mrb[12].mxu0 %v4014_v29  ;;  %3691 = vmatprep.mubr.bf16.mxu1 %v4065_v49 }
  0x4a   : > { %877 = vmatprep.mubr.bf16.mxu0 %v4015_v31  ;;  %3720 = vmatpush3.bf16.msra.mxu1 %v4077_v0 }
  0x4b   : > { %3721 = vmatprep.subr.bf16.mxu1 %v4078_v4 }
  0x4e   : > { %3722 = vmatpush3.bf16.msra.mxu1 %v4078_v4 }
  0x4f   : > { %3723 = vmatprep.subr.bf16.mxu1 %v4081_v6 }
  0x50   : > { %3692 = vmatmul.mubr.bf16.gmra.mrb[12].mxu1 %v4066_v52 }
  0x51   : > { %878 = vmatmul.mubr.bf16.gmra.mrb[16].mxu0 %v4017_v33  ;;  %3695 = vmatprep.mubr.bf16.mxu1 %v4067_v53 }
  0x52   : > { %885 = vmatprep.mubr.bf16.mxu0 %v4018_v35  ;;  %3724 = vmatpush3.bf16.msra.mxu1 %v4081_v6 }
  0x53   : > { %3725 = vmatprep.subr.bf16.mxu1 %v4082_v10 }
  0x56   : > { %3726 = vmatpush3.bf16.msra.mxu1 %v4082_v10 }
  0x58   : > { %3696 = vmatmul.mubr.bf16.gmra.mrb[16].mxu1 %v4068_v56 }
  0x59   : > { %886 = vmatmul.mubr.bf16.gmra.mrb[20].mxu0 %v4020_v39  ;;  %3699 = vmatprep.mubr.bf16.mxu1 %v4071_v57 }
  0x5a   : > { %893 = vmatprep.mubr.bf16.mxu0 %v4021_v41 }
  0x60   : > { %3700 = vmatmul.mubr.bf16.gmra.mrb[20].mxu1 %v4072_v60 }
  0x61   : > { %894 = vmatmul.mubr.bf16.gmra.mrb[24].mxu0 %v4023_v45  ;;  %3703 = vmatprep.mubr.bf16.mxu1 %v4075_v61 }
  0x62   : > { %901 = vmatprep.mubr.bf16.mxu0 %v4024_v47 }
  0x68   : > { %3704 = vmatmul.mubr.bf16.gmra.mrb[24].mxu1 %v4076_v1 }
  0x69   : > { %902 = vmatmul.mubr.bf16.gmra.mrb[28].mxu0 %v4026_v50  ;;  %3707 = vmatprep.mubr.bf16.mxu1 %v4079_v5 }
  0x6a   : > { %909 = vmatprep.mubr.bf16.mxu0 %v4027_v51 }
  0x70   : > { %3708 = vmatmul.mubr.bf16.gmra.mrb[28].mxu1 %v4080_v7 }
  0x71   : > { %910 = vmatmul.mubr.bf16.gmra.mrb[32].mxu0 %v4029_v54 }
  0x72   : > { %917 = vmatprep.mubr.bf16.mxu0 %v4030_v55 }
  0x79   : > { %918 = vmatmul.mubr.bf16.gmra.mrb[36].mxu0 %v4032_v58 }
  0x7a   : > { %925 = vmatprep.mubr.bf16.mxu0 %v4033_v59 }
  0x81   : > { %926 = vmatmul.mubr.bf16.gmra.mrb[40].mxu0 %v4035_v62 }
  0x82   : > { %933 = vmatprep.mubr.bf16.mxu0 %v4036_v63 }
  0x89   : > { %934 = vmatmul.mubr.bf16.gmra.mrb[44].mxu0 %v4038_v2 }
  0x8a   : > { %941 = vmatprep.mubr.bf16.mxu0 %v4039_v3 }
  0x91   : > { %942 = vmatmul.mubr.bf16.gmra.mrb[48].mxu0 %v4041_v8 }
  0x92   : > { %949 = vmatprep.mubr.bf16.mxu0 %v4042_v9 }
  0x99   : > { %950 = vmatmul.mubr.bf16.gmra.mrb[52].mxu0 %v4044_v11 }
  0x9a   : > { %957 = vmatprep.mubr.bf16.mxu0 %v4045_v12 }
  0xa1   : > { %958 = vmatmul.mubr.bf16.gmra.mrb[56].mxu0 %v4047_v13 }
  0xa2   : > { %965 = vmatprep.mubr.bf16.mxu0 %v4048_v14 }
  0xa9   : > { %966 = vmatmul.mubr.bf16.gmra.mrb[60].mxu0 %v4050_v15 }
 0x104   : > { %v3297_v16 = vpop.f32.mrb[0].mxu0 }
 0x105   : > { %v3298_v17 = vpop.f32.mrb[1].mxu0 }
 0x106   : > { %v3299_v18 = vadd.f32 %v3298_v17, %v3297_v16  ;;  %v3300_v19 = vpop.f32.mrb[2].mxu0 }
 0x107   : > { %v3301_v20 = vpop.f32.mrb[3].mxu0 }
 0x108   : > { %v3302_v21 = vadd.f32 %v3301_v20, %v3300_v19 }
 0x10a   : > { %v974_v22 = vpack.c.bf16 %v3302_v21, %v3299_v18 }
 0x10c   : > { %v3303_v23 = vpop.f32.mrb[4].mxu0  ;;  %3727 = vmatprep.mubr.bf16.mxu1 %v974_v22 }
 0x10d   : > { %v3304_v24 = vpop.f32.mrb[5].mxu0 }
 0x10e   : > { %v3305_v25 = vadd.f32 %v3304_v24, %v3303_v23  ;;  %v3306_v26 = vpop.f32.mrb[6].mxu0 }
 0x10f   : > { %v3307_v27 = vpop.f32.mrb[7].mxu0 }
 0x110   : > { %v3308_v28 = vadd.f32 %v3307_v27, %v3306_v26 }
 0x112   : > { %v975_v29 = vpack.c.bf16 %v3308_v28, %v3305_v25 }
 0x114   : > { %v3309_v30 = vpop.f32.mrb[8].mxu0  ;;  %3728 = vmatmul.mubr.bf16.vlgmr.msra.gmra.mrb[0].mxu1 %v975_v29 }
 0x115   : > { %v3310_v31 = vpop.f32.mrb[9].mxu0 }
 0x116   : > { %v3311_v32 = vadd.f32 %v3310_v31, %v3309_v30  ;;  %v3312_v33 = vpop.f32.mrb[10].mxu0 }
 0x117   : > { %v3313_v34 = vpop.f32.mrb[11].mxu0 }
 0x118   : > { %v3314_v35 = vadd.f32 %v3313_v34, %v3312_v33 }
 0x11a   : > { %v976_v36 = vpack.c.bf16 %v3314_v35, %v3311_v32 }
 0x11c   : > { %v3315_v37 = vpop.f32.mrb[12].mxu0  ;;  %3731 = vmatprep.mubr.bf16.mxu1 %v976_v36 }
 0x11d   : > { %v3316_v38 = vpop.f32.mrb[13].mxu0 }
 0x11e   : > { %v3317_v39 = vadd.f32 %v3316_v38, %v3315_v37  ;;  %v3318_v40 = vpop.f32.mrb[14].mxu0 }
 0x11f   : > { %v3319_v41 = vpop.f32.mrb[15].mxu0 }
 0x120   : > { %v3320_v42 = vadd.f32 %v3319_v41, %v3318_v40 }
 0x122   : > { %v977_v43 = vpack.c.bf16 %v3320_v42, %v3317_v39 }
 0x124   : > { %v3321_v44 = vpop.f32.mrb[16].mxu0  ;;  %3732 = vmatmul.mubr.bf16.gmra.mrb[4].mxu1 %v977_v43 }
 0x125   : > { %v3322_v45 = vpop.f32.mrb[17].mxu0 }
 0x126   : > { %v3323_v46 = vadd.f32 %v3322_v45, %v3321_v44  ;;  %v3324_v47 = vpop.f32.mrb[18].mxu0 }
 0x127   : > { %v3325_v48 = vpop.f32.mrb[19].mxu0 }
 0x128   : > { %v3326_v49 = vadd.f32 %v3325_v48, %v3324_v47 }
 0x12a   : > { %v978_v50 = vpack.c.bf16 %v3326_v49, %v3323_v46 }
 0x12c   : > { %v3327_v51 = vpop.f32.mrb[20].mxu0  ;;  %3735 = vmatprep.mubr.bf16.mxu1 %v978_v50 }
 0x12d   : > { %v3328_v52 = vpop.f32.mrb[21].mxu0 }
 0x12e   : > { %v3329_v53 = vadd.f32 %v3328_v52, %v3327_v51  ;;  %v3330_v54 = vpop.f32.mrb[22].mxu0 }
 0x12f   : > { %v3331_v55 = vpop.f32.mrb[23].mxu0 }
 0x130   : > { %v3332_v56 = vadd.f32 %v3331_v55, %v3330_v54 }
 0x132   : > { %v979_v57 = vpack.c.bf16 %v3332_v56, %v3329_v53 }
 0x134   : > { %v3333_v58 = vpop.f32.mrb[24].mxu0  ;;  %3736 = vmatmul.mubr.bf16.gmra.mrb[8].mxu1 %v979_v57 }
 0x135   : > { %v3334_v59 = vpop.f32.mrb[25].mxu0 }
 0x136   : > { %v3335_v60 = vadd.f32 %v3334_v59, %v3333_v58  ;;  %v3336_v61 = vpop.f32.mrb[26].mxu0 }
 0x137   : > { %v3337_v62 = vpop.f32.mrb[27].mxu0 }
 0x138   : > { %v3338_v63 = vadd.f32 %v3337_v62, %v3336_v61 }
 0x13a   : > { %v980_v0 = vpack.c.bf16 %v3338_v63, %v3335_v60 }
 0x13c   : > { %v3339_v1 = vpop.f32.mrb[28].mxu0  ;;  %3739 = vmatprep.mubr.bf16.mxu1 %v980_v0  ;;  %v4503_v0 = vld [vmem:[%s4278_s23] ss:$0 sm:$0xff] }
 0x13d   : > { %v3340_v2 = vpop.f32.mrb[29].mxu0 }
 0x13e   : > { %v3341_v3 = vadd.f32 %v3340_v2, %v3339_v1  ;;  %v3342_v4 = vpop.f32.mrb[30].mxu0 }
 0x13f   : > { %v3343_v5 = vpop.f32.mrb[31].mxu0 }
 0x140   : > { %v3344_v6 = vadd.f32 %v3343_v5, %v3342_v4 }
 0x142   : > { %v981_v7 = vpack.c.bf16 %v3344_v6, %v3341_v3 }
 0x144   : > { %v3345_v8 = vpop.f32.mrb[32].mxu0  ;;  %3740 = vmatmul.mubr.bf16.gmra.mrb[12].mxu1 %v981_v7 }
 0x145   : > { %v3346_v9 = vpop.f32.mrb[33].mxu0 }
 0x146   : > { %v3347_v10 = vadd.f32 %v3346_v9, %v3345_v8  ;;  %v3348_v11 = vpop.f32.mrb[34].mxu0 }
 0x147   : > { %v3349_v12 = vpop.f32.mrb[35].mxu0 }
 0x148   : > { %v3350_v13 = vadd.f32 %v3349_v12, %v3348_v11 }
 0x14a   : > { %v982_v14 = vpack.c.bf16 %v3350_v13, %v3347_v10 }
 0x14c   : > { %v3351_v15 = vpop.f32.mrb[36].mxu0  ;;  %3743 = vmatprep.mubr.bf16.mxu1 %v982_v14 }
 0x14d   : > { %v3352_v16 = vpop.f32.mrb[37].mxu0 }
 0x14e   : > { %v3353_v17 = vadd.f32 %v3352_v16, %v3351_v15  ;;  %v3354_v18 = vpop.f32.mrb[38].mxu0 }
 0x14f   : > { %v3355_v19 = vpop.f32.mrb[39].mxu0 }
 0x150   : > { %v3356_v20 = vadd.f32 %v3355_v19, %v3354_v18 }
 0x152   : > { %v983_v21 = vpack.c.bf16 %v3356_v20, %v3353_v17 }
 0x154   : > { %v3357_v22 = vpop.f32.mrb[40].mxu0  ;;  %3744 = vmatmul.mubr.bf16.gmra.mrb[16].mxu1 %v983_v21 }
 0x155   : > { %v3358_v23 = vpop.f32.mrb[41].mxu0 }
 0x156   : > { %v3359_v24 = vadd.f32 %v3358_v23, %v3357_v22  ;;  %v3360_v25 = vpop.f32.mrb[42].mxu0 }
 0x157   : > { %v3361_v26 = vpop.f32.mrb[43].mxu0 }
 0x158   : > { %v3362_v27 = vadd.f32 %v3361_v26, %v3360_v25 }
 0x15a   : > { %v984_v28 = vpack.c.bf16 %v3362_v27, %v3359_v24 }
 0x15c   : > { %v3363_v29 = vpop.f32.mrb[44].mxu0  ;;  %3747 = vmatprep.mubr.bf16.mxu1 %v984_v28 }
 0x15d   : > { %v3364_v30 = vpop.f32.mrb[45].mxu0 }
 0x15e   : > { %v3365_v31 = vadd.f32 %v3364_v30, %v3363_v29  ;;  %v3366_v32 = vpop.f32.mrb[46].mxu0 }
 0x15f   : > { %v3367_v33 = vpop.f32.mrb[47].mxu0 }
 0x160   : > { %v3368_v34 = vadd.f32 %v3367_v33, %v3366_v32 }
 0x162   : > { %v985_v35 = vpack.c.bf16 %v3368_v34, %v3365_v31 }
 0x164   : > { %v3369_v36 = vpop.f32.mrb[48].mxu0  ;;  %3748 = vmatmul.mubr.bf16.gmra.mrb[20].mxu1 %v985_v35 }
 0x165   : > { %v3370_v37 = vpop.f32.mrb[49].mxu0 }
 0x166   : > { %v3371_v38 = vadd.f32 %v3370_v37, %v3369_v36  ;;  %v3372_v39 = vpop.f32.mrb[50].mxu0 }
 0x167   : > { %v3373_v40 = vpop.f32.mrb[51].mxu0 }
 0x168   : > { %v3374_v41 = vadd.f32 %v3373_v40, %v3372_v39 }
 0x16a   : > { %v986_v42 = vpack.c.bf16 %v3374_v41, %v3371_v38 }
 0x16c   : > { %v3375_v43 = vpop.f32.mrb[52].mxu0  ;;  %3751 = vmatprep.mubr.bf16.mxu1 %v986_v42 }
 0x16d   : > { %v3376_v44 = vpop.f32.mrb[53].mxu0 }
 0x16e   : > { %v3377_v45 = vadd.f32 %v3376_v44, %v3375_v43  ;;  %v3378_v46 = vpop.f32.mrb[54].mxu0 }
 0x16f   : > { %v3379_v47 = vpop.f32.mrb[55].mxu0 }
 0x170   : > { %v3380_v48 = vadd.f32 %v3379_v47, %v3378_v46 }
 0x172   : > { %v987_v49 = vpack.c.bf16 %v3380_v48, %v3377_v45 }
 0x174   : > { %v3381_v50 = vpop.f32.mrb[56].mxu0  ;;  %3752 = vmatmul.mubr.bf16.gmra.mrb[24].mxu1 %v987_v49 }
 0x175   : > { %v3382_v51 = vpop.f32.mrb[57].mxu0 }
 0x176   : > { %v3383_v52 = vadd.f32 %v3382_v51, %v3381_v50  ;;  %v3384_v53 = vpop.f32.mrb[58].mxu0 }
 0x177   : > { %v3385_v54 = vpop.f32.mrb[59].mxu0 }
 0x178   : > { %v3386_v55 = vadd.f32 %v3385_v54, %v3384_v53 }
 0x17a   : > { %v988_v56 = vpack.c.bf16 %v3386_v55, %v3383_v52 }
 0x17c   : > { %v3387_v57 = vpop.f32.mrb[60].mxu0  ;;  %3755 = vmatprep.mubr.bf16.mxu1 %v988_v56 }
 0x17d   : > { %v3388_v58 = vpop.f32.mrb[61].mxu0 }
 0x17e   : > { %v3389_v59 = vadd.f32 %v3388_v58, %v3387_v57  ;;  %v3390_v60 = vpop.f32.mrb[62].mxu0 }
 0x17f   : > { %v3391_v61 = vpop.f32.mrb[63].mxu0 }
 0x180   : > { %v3392_v62 = vadd.f32 %v3391_v61, %v3390_v60 }
 0x182   : > { %v989_v63 = vpack.c.bf16 %v3392_v62, %v3389_v59 }
 0x184   : > { %3756 = vmatmul.mubr.bf16.gmra.mrb[28].mxu1 %v989_v63 }
 0x1e7   : > { %v3729_v1 = vpop.f32.mrb[0].mxu1 }
 0x1e8   : > { %v1545_v2 = vadd.f32 %v3729_v1, %v4503_v0  ;;  %v1409_v3 = vpop.f32.mrb[1].mxu1 }
 0x1e9   : > { %v1543_v4 = vadd.f32 %v4503_v0, %v1409_v3  ;;  %v3730_v5 = vpop.f32.mrb[2].mxu1 }
 0x1ea   : > { %v1546_v6 = vadd.f32 %v3730_v5, %v4503_v0  ;;  %v1412_v7 = vpop.f32.mrb[3].mxu1  ;;  %v1577_v9 = vmax.f32 %v1545_v2, 0.0 }
 0x1eb   : > { %v1544_v8 = vadd.f32 %v4503_v0, %v1412_v7  ;;  %v1575_v11 = vmax.f32 %v1543_v4, 0.0 }
 0x1ec   : > { %v1578_v10 = vmax.f32 %v1546_v6, 0.0 }
 0x1ed   : > { %v1576_v12 = vmax.f32 %v1544_v8, 0.0 }
 0x1ee   : > { %v4511_v13 = vpack.c.bf16 %v1578_v10, %v1577_v9 }
 0x1ef   : > { %v4513_v14 = vpack.c.bf16 %v1576_v12, %v1575_v11 }
 0x1f0   : > { %1630 = vst [vmem:[%s4515_s28 + $0x8] sm:$0xff] %v4511_v13 }
 0x1f1   : > { %1629 = vst [vmem:[%s4515_s28] sm:$0xff] %v4513_v14 }
 0x1f7   : > { %v3733_v15 = vpop.f32.mrb[4].mxu1 }
 0x1f8   : > { %v1549_v16 = vadd.f32 %v3733_v15, %v4503_v0  ;;  %v1425_v17 = vpop.f32.mrb[5].mxu1 }
 0x1f9   : > { %v1547_v18 = vadd.f32 %v4503_v0, %v1425_v17  ;;  %v3734_v19 = vpop.f32.mrb[6].mxu1 }
 0x1fa   : > { %v1550_v20 = vadd.f32 %v3734_v19, %v4503_v0  ;;  %v1428_v21 = vpop.f32.mrb[7].mxu1  ;;  %v1581_v23 = vmax.f32 %v1549_v16, 0.0 }
 0x1fb   : > { %v1548_v22 = vadd.f32 %v4503_v0, %v1428_v21  ;;  %v1579_v25 = vmax.f32 %v1547_v18, 0.0 }
 0x1fc   : > { %v1582_v24 = vmax.f32 %v1550_v20, 0.0 }
 0x1fd   : > { %v1580_v26 = vmax.f32 %v1548_v22, 0.0 }
 0x1fe   : > { %v4525_v27 = vpack.c.bf16 %v1582_v24, %v1581_v23 }
 0x1ff   : > { %v4527_v28 = vpack.c.bf16 %v1580_v26, %v1579_v25 }
 0x200   : > { %1632 = vst [vmem:[%s4515_s28 + $0x18] sm:$0xff] %v4525_v27 }
 0x201   : > { %1631 = vst [vmem:[%s4515_s28 + $0x10] sm:$0xff] %v4527_v28 }
 0x207   : > { %v3737_v29 = vpop.f32.mrb[8].mxu1 }
 0x208   : > { %v1553_v30 = vadd.f32 %v3737_v29, %v4503_v0  ;;  %v1441_v31 = vpop.f32.mrb[9].mxu1 }
 0x209   : > { %v1551_v32 = vadd.f32 %v4503_v0, %v1441_v31  ;;  %v3738_v33 = vpop.f32.mrb[10].mxu1 }
 0x20a   : > { %v1554_v34 = vadd.f32 %v3738_v33, %v4503_v0  ;;  %v1444_v35 = vpop.f32.mrb[11].mxu1  ;;  %v1585_v37 = vmax.f32 %v1553_v30, 0.0 }
 0x20b   : > { %v1552_v36 = vadd.f32 %v4503_v0, %v1444_v35  ;;  %v1583_v39 = vmax.f32 %v1551_v32, 0.0 }
 0x20c   : > { %v1586_v38 = vmax.f32 %v1554_v34, 0.0 }
 0x20d   : > { %v1584_v40 = vmax.f32 %v1552_v36, 0.0 }
 0x20e   : > { %v4537_v41 = vpack.c.bf16 %v1586_v38, %v1585_v37 }
 0x20f   : > { %v4539_v42 = vpack.c.bf16 %v1584_v40, %v1583_v39 }
 0x210   : > { %1634 = vst [vmem:[%s4515_s28 + $0x28] sm:$0xff] %v4537_v41 }
 0x211   : > { %1633 = vst [vmem:[%s4515_s28 + $0x20] sm:$0xff] %v4539_v42 }
 0x217   : > { %v3741_v43 = vpop.f32.mrb[12].mxu1 }
 0x218   : > { %v1557_v44 = vadd.f32 %v3741_v43, %v4503_v0  ;;  %v1457_v45 = vpop.f32.mrb[13].mxu1 }
 0x219   : > { %v1555_v46 = vadd.f32 %v4503_v0, %v1457_v45  ;;  %v3742_v47 = vpop.f32.mrb[14].mxu1 }
 0x21a   : > { %v1558_v48 = vadd.f32 %v3742_v47, %v4503_v0  ;;  %v1460_v49 = vpop.f32.mrb[15].mxu1  ;;  %v1589_v51 = vmax.f32 %v1557_v44, 0.0 }
 0x21b   : > { %v1556_v50 = vadd.f32 %v4503_v0, %v1460_v49  ;;  %v1587_v53 = vmax.f32 %v1555_v46, 0.0 }
 0x21c   : > { %v1590_v52 = vmax.f32 %v1558_v48, 0.0 }
 0x21d   : > { %v1588_v54 = vmax.f32 %v1556_v50, 0.0 }
 0x21e   : > { %v4549_v55 = vpack.c.bf16 %v1590_v52, %v1589_v51 }
 0x21f   : > { %v4551_v56 = vpack.c.bf16 %v1588_v54, %v1587_v53 }
 0x220   : > { %1636 = vst [vmem:[%s4515_s28 + $0x38] sm:$0xff] %v4549_v55 }
 0x221   : > { %1635 = vst [vmem:[%s4515_s28 + $0x30] sm:$0xff] %v4551_v56 }
 0x227   : > { %v3745_v57 = vpop.f32.mrb[16].mxu1 }
 0x228   : > { %v1561_v58 = vadd.f32 %v3745_v57, %v4503_v0  ;;  %v1473_v59 = vpop.f32.mrb[17].mxu1 }
 0x229   : > { %v1559_v60 = vadd.f32 %v4503_v0, %v1473_v59  ;;  %v3746_v61 = vpop.f32.mrb[18].mxu1 }
 0x22a   : > { %v1562_v62 = vadd.f32 %v3746_v61, %v4503_v0  ;;  %v1476_v63 = vpop.f32.mrb[19].mxu1  ;;  %v1593_v2 = vmax.f32 %v1561_v58, 0.0  ;;  %v4085_v58 = vld [vmem:[%s4957_s5 + $0x4] ss:$8 sps:$4 sm:$0xff] (!%p3192_p8)  }
 0x22b   : > { %v1560_v1 = vadd.f32 %v4503_v0, %v1476_v63  ;;  %v1591_v4 = vmax.f32 %v1559_v60, 0.0  ;;  %1701 = vmatprep.mubr.bf16.mxu0 (!%p3192_p8), %v4085_v58 }
 0x22c   : > { %v1594_v3 = vmax.f32 %v1562_v62, 0.0 }
 0x22d   : > { %v1592_v5 = vmax.f32 %v1560_v1, 0.0 }
 0x22e   : > { %v1616_v6 = vpack.c.bf16 %v1594_v3, %v1593_v2 }
 0x22f   : > { %v1615_v7 = vpack.c.bf16 %v1592_v5, %v1591_v4 }
 0x230   : > { %1638 = vst [vmem:[%s4515_s28 + $0x48] sm:$0xff] %v1616_v6 }
 0x231   : > { %1637 = vst [vmem:[%s4515_s28 + $0x40] sm:$0xff] %v1615_v7  ;;  %3441 = vmatprep.subr.bf16.mxu0 (!%p3192_p8), %v1615_v7 }
 0x232   : > { %3442 = vmatpush3.bf16.msra.mxu0 (!%p3192_p8), %v4513_v14 }
 0x233   : > { %3443 = vmatprep.subr.bf16.mxu0 (!%p3192_p8), %v1616_v6 }
 0x236   : > { %3444 = vmatpush3.bf16.msra.mxu0 (!%p3192_p8), %v4511_v13 }
 0x237   : > { %v3749_v8 = vpop.f32.mrb[20].mxu1 }
 0x238   : > { %v1565_v9 = vadd.f32 %v3749_v8, %v4503_v0  ;;  %v1489_v10 = vpop.f32.mrb[21].mxu1 }
 0x239   : > { %v1563_v11 = vadd.f32 %v4503_v0, %v1489_v10  ;;  %v3750_v12 = vpop.f32.mrb[22].mxu1 }
 0x23a   : > { %v1566_v15 = vadd.f32 %v3750_v12, %v4503_v0  ;;  %v1492_v16 = vpop.f32.mrb[23].mxu1  ;;  %v1597_v18 = vmax.f32 %v1565_v9, 0.0 }
 0x23b   : > { %v1564_v17 = vadd.f32 %v4503_v0, %v1492_v16  ;;  %v1595_v20 = vmax.f32 %v1563_v11, 0.0 }
 0x23c   : > { %v1598_v19 = vmax.f32 %v1566_v15, 0.0 }
 0x23d   : > { %v1596_v21 = vmax.f32 %v1564_v17, 0.0 }
 0x23e   : > { %v1618_v22 = vpack.c.bf16 %v1598_v19, %v1597_v18 }
 0x23f   : > { %v1617_v23 = vpack.c.bf16 %v1596_v21, %v1595_v20 }
 0x240   : > { %1640 = vst [vmem:[%s4515_s28 + $0x58] sm:$0xff] %v1618_v22 }
 0x241   : > { %1639 = vst [vmem:[%s4515_s28 + $0x50] sm:$0xff] %v1617_v23  ;;  %3445 = vmatprep.subr.bf16.mxu0 (!%p3192_p8), %v1617_v23 }
 0x242   : > { %3446 = vmatpush3.bf16.msra.mxu0 (!%p3192_p8), %v4527_v28 }
 0x243   : > { %3447 = vmatprep.subr.bf16.mxu0 (!%p3192_p8), %v1618_v22 }
 0x246   : > { %3448 = vmatpush3.bf16.msra.mxu0 (!%p3192_p8), %v4525_v27 }
 0x247   : > { %v3753_v24 = vpop.f32.mrb[24].mxu1 }
 0x248   : > { %v1569_v25 = vadd.f32 %v3753_v24, %v4503_v0  ;;  %v1505_v26 = vpop.f32.mrb[25].mxu1 }
 0x249   : > { %v1567_v29 = vadd.f32 %v4503_v0, %v1505_v26  ;;  %v3754_v30 = vpop.f32.mrb[26].mxu1 }
 0x24a   : > { %v1570_v31 = vadd.f32 %v3754_v30, %v4503_v0  ;;  %v1508_v32 = vpop.f32.mrb[27].mxu1  ;;  %v1601_v34 = vmax.f32 %v1569_v25, 0.0 }
 0x24b   : > { %v1568_v33 = vadd.f32 %v4503_v0, %v1508_v32  ;;  %v1599_v36 = vmax.f32 %v1567_v29, 0.0 }
 0x24c   : > { %v1602_v35 = vmax.f32 %v1570_v31, 0.0 }
 0x24d   : > { %v1600_v37 = vmax.f32 %v1568_v33, 0.0 }
 0x24e   : > { %v1620_v38 = vpack.c.bf16 %v1602_v35, %v1601_v34 }
 0x24f   : > { %v1619_v39 = vpack.c.bf16 %v1600_v37, %v1599_v36 }
 0x250   : > { %1642 = vst [vmem:[%s4515_s28 + $0x68] sm:$0xff] %v1620_v38 }
 0x251   : > { %1641 = vst [vmem:[%s4515_s28 + $0x60] sm:$0xff] %v1619_v39  ;;  %3449 = vmatprep.subr.bf16.mxu0 (!%p3192_p8), %v1619_v39 }
 0x252   : > { %3450 = vmatpush3.bf16.msra.mxu0 (!%p3192_p8), %v4539_v42 }
 0x253   : > { %3451 = vmatprep.subr.bf16.mxu0 (!%p3192_p8), %v1620_v38 }
 0x256   : > { %3452 = vmatpush3.bf16.msra.mxu0 (!%p3192_p8), %v4537_v41 }
 0x257   : > { %v3757_v40 = vpop.f32.mrb[28].mxu1 }
 0x258   : > { %v1573_v43 = vadd.f32 %v3757_v40, %v4503_v0  ;;  %v1521_v44 = vpop.f32.mrb[29].mxu1 }
 0x259   : > { %v1571_v45 = vadd.f32 %v4503_v0, %v1521_v44  ;;  %v3758_v46 = vpop.f32.mrb[30].mxu1 }
 0x25a   : > { %v1574_v47 = vadd.f32 %v3758_v46, %v4503_v0  ;;  %v1524_v48 = vpop.f32.mrb[31].mxu1  ;;  %v1605_v50 = vmax.f32 %v1573_v43, 0.0 }
 0x25b   : > { %v1572_v49 = vadd.f32 %v4503_v0, %v1524_v48  ;;  %v1603_v52 = vmax.f32 %v1571_v45, 0.0  ;;  %1648 = sbr.rel (%p3192_p8) target bundleno = 835 (0x343), region = 68  ;;  %v4083_v0 = vld [vmem:[%s4957_s5] ss:$8 sps:$4 sm:$0xff] (!%p3192_p8)  }
 0x25c   : > { %v1606_v51 = vmax.f32 %v1574_v47, 0.0 }
 0x25d   : > { %v1604_v53 = vmax.f32 %v1572_v49, 0.0 }
 0x25e   : > { %v1622_v54 = vpack.c.bf16 %v1606_v51, %v1605_v50 }
 0x25f   : > { %v1621_v57 = vpack.c.bf16 %v1604_v53, %v1603_v52 }
 0x260   : > { %1644 = vst [vmem:[%s4515_s28 + $0x78] sm:$0xff] %v1622_v54 }
 0x261   : > { %1643 = vst [vmem:[%s4515_s28 + $0x70] sm:$0xff] %v1621_v57  ;;  %3453 = vmatprep.subr.bf16.mxu0 (!%p3192_p8), %v1621_v57 }
 0x262   : > { %3454 = vmatpush3.bf16.msra.mxu0 %v4551_v56 }
 0x263   : > { %3455 = vmatprep.subr.bf16.mxu0 %v1622_v54 }
 0x266   : > { %3456 = vmatpush3.bf16.msra.mxu0 %v4549_v55 }
 0x269   : > { %1702 = vmatmul.mubr.bf16.vlgmr.msra.gmra.mrb[0].mxu0 %v4083_v0 }
 0x33c   : > { %v3457_v13 = vpop.f32.mrb[0].mxu0 }
 0x33d   : > { %v3458_v14 = vpop.f32.mrb[1].mxu0 }
 0x33e   : > { %v3459_v27 = vadd.f32 %v3458_v14, %v3457_v13  ;;  %v3460_v28 = vpop.f32.mrb[2].mxu0 }
 0x33f   : > { %v3461_v59 = vpop.f32.mrb[3].mxu0 }
 0x340   : > { %v3462_v42 = vadd.f32 %v3461_v59, %v3460_v28  ;;  %1712 = vst [vmem:[#allocation3] sm:$0xff] %v3459_v27 }
 0x342   : > { %1713 = vst [vmem:[#allocation3 + $0x8] sm:$0xff] %v3462_v42 }
 0x343 PF: > { %p3195_p9 = scmp.eq.s32.totalorder %s4183_s13, 0 }
 0x344   : > { %s3277_s22 = sshll.u32 (!%p3195_p9), %s4970_s12, 7  ;;  %v4088_v41 = vld [vmem:[%s4952_s0 + $0x4] ss:$8 sps:$4 sm:$0xff] (!%p3195_p9)   ;;  %v4086_v15 = vld [vmem:[%s4952_s0] ss:$8 sps:$4 sm:$0xff] (!%p3195_p9)   ;;  %v4136_v16 = vld [vmem:[%s4288_s29 + $0x10] sm:$0xff] (!%p3195_p9)  }
 0x345   : > { %1717 = sbr.rel (%p3195_p9) target bundleno = 1660 (0x67c), region = 76  ;;  %s4601_s20 = scalar_lea.vmem (!%p3195_p9), [#allocation2], %s3277_s22  ;;  %1982 = vmatprep.mubr.bf16.mxu0 (!%p3195_p9), %v4088_v41  ;;  %v4134_v10 = vld [vmem:[%s4288_s29] sm:$0xff] (!%p3195_p9)   ;;  %v4135_v11 = vld [vmem:[%s4288_s29 + $0x8] sm:$0xff] (!%p3195_p9)   ;;  %v4089_v17 = vld [vmem:[%s4952_s0 + $0x14] ss:$8 sps:$4 sm:$0xff] (!%p3195_p9)  }
 0x346   : > { %3759 = vmatprep.subr.bf16.mxu1 (!%p3195_p9), %v4134_v10  ;;  %v4137_v18 = vld [vmem:[%s4288_s29 + $0x18] sm:$0xff] (!%p3195_p9)   ;;  %v4092_v20 = vld [vmem:[%s4952_s0 + $0x24] ss:$8 sps:$4 sm:$0xff] (!%p3195_p9)   ;;  %v4094_v23 = vld [vmem:[%s4952_s0 + $0x20] ss:$8 sps:$4 sm:$0xff] (!%p3195_p9)   ;;  %s3279_s28 = sshll.u32 (!%p3195_p9), %s451_s17, 7 }
 0x347   : > { %3760 = vmatpush3.bf16.msra.mxu1 (!%p3195_p9), %v4134_v10  ;;  %v4091_v19 = vld [vmem:[%s4952_s0 + $0x10] ss:$8 sps:$4 sm:$0xff] (!%p3195_p9)   ;;  %v4138_v21 = vld [vmem:[%s4288_s29 + $0x20] sm:$0xff] (!%p3195_p9)   ;;  %v4139_v22 = vld [vmem:[%s4288_s29 + $0x28] sm:$0xff] (!%p3195_p9)   ;;  %p3250_p10 = scmp.ne.s32.totalorder (!%p3195_p9), %s4183_s13, 2 }
 0x348   : > { %3761 = vmatprep.subr.bf16.mxu1 (!%p3195_p9), %v4135_v11  ;;  %v4140_v24 = vld [vmem:[%s4288_s29 + $0x30] sm:$0xff] (!%p3195_p9)   ;;  %v4141_v26 = vld [vmem:[%s4288_s29 + $0x38] sm:$0xff] (!%p3195_p9)   ;;  %v4142_v30 = vld [vmem:[%s4283_s26] sm:$0xff] (!%p3195_p9)  }
 0x349   : > { %v4604_v55 = vld [vmem:[%s4601_s20 + $0x40] sm:$0xff] (!%p3195_p9)  ;;  %v4608_v60 = vld [vmem:[%s4601_s20 + $0x48] sm:$0xff] (!%p3195_p9)  ;;  %v4616_v62 = vld [vmem:[%s4601_s20 + $0x50] sm:$0xff] (!%p3195_p9) }
 0x34a   : > { %v1721_v56 = vld [vmem:[%s4601_s20] sm:$0xff] (!%p3195_p9)  ;;  %3463 = vmatprep.subr.bf16.mxu0 (!%p3195_p9), %v4604_v55  ;;  %v4613_v61 = vld [vmem:[%s4601_s20 + $0x8] sm:$0xff] (!%p3195_p9)  ;;  %v4621_v63 = vld [vmem:[%s4601_s20 + $0x10] sm:$0xff] (!%p3195_p9) }
 0x34b   : > { %3464 = vmatpush3.bf16.msra.mxu0 (!%p3195_p9), %v1721_v56  ;;  %3775 = vmatprep.mubr.bf16.mxu1 (!%p3195_p9), %v1721_v56  ;;  %v4624_v1 = vld [vmem:[%s4601_s20 + $0x58] sm:$0xff] (!%p3195_p9)  ;;  %v4632_v3 = vld [vmem:[%s4601_s20 + $0x60] sm:$0xff] (!%p3195_p9)  ;;  %v4640_v5 = vld [vmem:[%s4601_s20 + $0x68] sm:$0xff] (!%p3195_p9) }
 0x34c   : > { %3465 = vmatprep.subr.bf16.mxu0 %v4608_v60  ;;  %v4629_v2 = vld [vmem:[%s4601_s20 + $0x18] sm:$0xff]  ;;  %v4637_v4 = vld [vmem:[%s4601_s20 + $0x20] sm:$0xff]  ;;  %v4645_v6 = vld [vmem:[%s4601_s20 + $0x28] sm:$0xff]  ;;  %3762 = vmatpush3.bf16.msra.mxu1 %v4135_v11 }
 0x34d   : > { %v4648_v7 = vld [vmem:[%s4601_s20 + $0x70] sm:$0xff]  ;;  %v4656_v9 = vld [vmem:[%s4601_s20 + $0x78] sm:$0xff]  ;;  %3763 = vmatprep.subr.bf16.mxu1 %v4136_v16  ;;  %v4098_v31 = vld [vmem:[%s4952_s0 + $0x44] ss:$8 sps:$4 sm:$0xff]  }
 0x34e   : > { %v4653_v8 = vld [vmem:[%s4601_s20 + $0x30] sm:$0xff]  ;;  %v4663_v12 = vld [vmem:[%s4601_s20 + $0x38] sm:$0xff]  ;;  %v4143_v32 = vld [vmem:[%s4283_s26 + $0x8] sm:$0xff]  }
 0x34f   : > { %3466 = vmatpush3.bf16.msra.mxu0 %v4613_v61  ;;  %v4095_v25 = vld [vmem:[%s4952_s0 + $0x34] ss:$8 sps:$4 sm:$0xff]   ;;  %v4097_v29 = vld [vmem:[%s4952_s0 + $0x30] ss:$8 sps:$4 sm:$0xff]   ;;  %v4100_v33 = vld [vmem:[%s4952_s0 + $0x40] ss:$8 sps:$4 sm:$0xff]  }
 0x350   : > { %3467 = vmatprep.subr.bf16.mxu0 %v4616_v62  ;;  %3764 = vmatpush3.bf16.msra.mxu1 %v4136_v16  ;;  %v4144_v34 = vld [vmem:[%s4283_s26 + $0x10] sm:$0xff]   ;;  %v4145_v36 = vld [vmem:[%s4283_s26 + $0x18] sm:$0xff]   ;;  %v4104_v38 = vld [vmem:[%s4952_s0 + $0x64] ss:$8 sps:$4 sm:$0xff]  }
 0x351   : > { %3765 = vmatprep.subr.bf16.mxu1 %v4137_v18  ;;  %v4101_v35 = vld [vmem:[%s4952_s0 + $0x54] ss:$8 sps:$4 sm:$0xff]   ;;  %v4103_v37 = vld [vmem:[%s4952_s0 + $0x50] ss:$8 sps:$4 sm:$0xff]   ;;  %v4106_v39 = vld [vmem:[%s4952_s0 + $0x60] ss:$8 sps:$4 sm:$0xff]  }
 0x352   : > { %v4107_v40 = vld [vmem:[%s4952_s0 + $0x74] ss:$8 sps:$4 sm:$0xff]   ;;  %v4109_v43 = vld [vmem:[%s4952_s0 + $0x70] ss:$8 sps:$4 sm:$0xff]   ;;  %v4110_v44 = vld [vmem:[%s4952_s0 + $0x84] ss:$8 sps:$4 sm:$0xff]  }
 0x353   : > { %3468 = vmatpush3.bf16.msra.mxu0 %v4621_v63  ;;  %v4112_v45 = vld [vmem:[%s4952_s0 + $0x80] ss:$8 sps:$4 sm:$0xff]   ;;  %v4113_v46 = vld [vmem:[%s4952_s0 + $0x94] ss:$8 sps:$4 sm:$0xff]   ;;  %v4115_v47 = vld [vmem:[%s4952_s0 + $0x90] ss:$8 sps:$4 sm:$0xff]  }
 0x354   : > { %3469 = vmatprep.subr.bf16.mxu0 %v4624_v1  ;;  %3766 = vmatpush3.bf16.msra.mxu1 %v4137_v18  ;;  %v4116_v48 = vld [vmem:[%s4952_s0 + $0xa4] ss:$8 sps:$4 sm:$0xff]   ;;  %v4118_v49 = vld [vmem:[%s4952_s0 + $0xa0] ss:$8 sps:$4 sm:$0xff]   ;;  %v4119_v50 = vld [vmem:[%s4952_s0 + $0xb4] ss:$8 sps:$4 sm:$0xff]  }
 0x355   : > { %3767 = vmatprep.subr.bf16.mxu1 %v4138_v21  ;;  %v4146_v51 = vld [vmem:[%s4283_s26 + $0x20] sm:$0xff]   ;;  %v4121_v52 = vld [vmem:[%s4952_s0 + $0xb0] ss:$8 sps:$4 sm:$0xff]   ;;  %v4147_v54 = vld [vmem:[%s4283_s26 + $0x28] sm:$0xff]  }
 0x356   : > { %v4122_v53 = vld [vmem:[%s4952_s0 + $0xc4] ss:$8 sps:$4 sm:$0xff]   ;;  %v4148_v57 = vld [vmem:[%s4283_s26 + $0x30] sm:$0xff]   ;;  %v4124_v58 = vld [vmem:[%s4952_s0 + $0xc0] ss:$8 sps:$4 sm:$0xff]  }
 0x357   : > { %3470 = vmatpush3.bf16.msra.mxu0 %v4629_v2  ;;  %v4125_v0 = vld [vmem:[%s4952_s0 + $0xd4] ss:$8 sps:$4 sm:$0xff]   ;;  %v4127_v14 = vld [vmem:[%s4952_s0 + $0xd0] ss:$8 sps:$4 sm:$0xff]   ;;  %v4128_v27 = vld [vmem:[%s4952_s0 + $0xe4] ss:$8 sps:$4 sm:$0xff]  }
 0x358   : > { %3471 = vmatprep.subr.bf16.mxu0 %v4632_v3  ;;  %3768 = vmatpush3.bf16.msra.mxu1 %v4138_v21  ;;  %v4149_v13 = vld [vmem:[%s4283_s26 + $0x38] sm:$0xff]   ;;  %v4130_v28 = vld [vmem:[%s4952_s0 + $0xe0] ss:$8 sps:$4 sm:$0xff]  }
 0x359   : > { %3769 = vmatprep.subr.bf16.mxu1 %v4139_v22  ;;  %v4131_v59 = vld [vmem:[%s4952_s0 + $0xf4] ss:$8 sps:$4 sm:$0xff]   ;;  %v4133_v42 = vld [vmem:[%s4952_s0 + $0xf0] ss:$8 sps:$4 sm:$0xff]  }
 0x35b   : > { %3472 = vmatpush3.bf16.msra.mxu0 %v4637_v4 }
 0x35c   : > { %3473 = vmatprep.subr.bf16.mxu0 %v4640_v5  ;;  %3770 = vmatpush3.bf16.msra.mxu1 %v4139_v22 }
 0x35d   : > { %3771 = vmatprep.subr.bf16.mxu1 %v4140_v24 }
 0x35f   : > { %3474 = vmatpush3.bf16.msra.mxu0 %v4645_v6 }
 0x360   : > { %3475 = vmatprep.subr.bf16.mxu0 %v4648_v7  ;;  %3772 = vmatpush3.bf16.msra.mxu1 %v4140_v24 }
 0x361   : > { %3773 = vmatprep.subr.bf16.mxu1 %v4141_v26 }
 0x363   : > { %3476 = vmatpush3.bf16.msra.mxu0 %v4653_v8 }
 0x364   : > { %3477 = vmatprep.subr.bf16.mxu0 %v4656_v9  ;;  %3774 = vmatpush3.bf16.msra.mxu1 %v4141_v26 }
 0x365   : > { %3807 = vmatprep.subr.bf16.mxu1 %v4142_v30 }
 0x367   : > { %3478 = vmatpush3.bf16.msra.mxu0 %v4663_v12  ;;  %3776 = vmatmul.mubr.bf16.vlgmr.msra.gmra.mrb[0].mxu1 %v4613_v61 }
 0x368   : > { %3779 = vmatprep.mubr.bf16.mxu1 %v4621_v63  ;;  %3808 = vmatpush3.bf16.msra.mxu1 %v4142_v30 }
 0x369   : > { %3809 = vmatprep.subr.bf16.mxu1 %v4143_v32 }
 0x36a   : > { %1983 = vmatmul.mubr.bf16.vlgmr.msra.gmra.mrb[0].mxu0 %v4086_v15 }
 0x36b   : > { %1990 = vmatprep.mubr.bf16.mxu0 %v4089_v17 }
 0x36c   : > { %3810 = vmatpush3.bf16.msra.mxu1 %v4143_v32 }
 0x36d   : > { %3811 = vmatprep.subr.bf16.mxu1 %v4144_v34 }
 0x36f   : > { %3780 = vmatmul.mubr.bf16.gmra.mrb[4].mxu1 %v4629_v2 }
 0x370   : > { %3783 = vmatprep.mubr.bf16.mxu1 %v4637_v4  ;;  %3812 = vmatpush3.bf16.msra.mxu1 %v4144_v34 }
 0x371   : > { %3813 = vmatprep.subr.bf16.mxu1 %v4145_v36 }
 0x372   : > { %1991 = vmatmul.mubr.bf16.gmra.mrb[4].mxu0 %v4091_v19 }
 0x373   : > { %1998 = vmatprep.mubr.bf16.mxu0 %v4092_v20 }
 0x374   : > { %3814 = vmatpush3.bf16.msra.mxu1 %v4145_v36 }
 0x375   : > { %3815 = vmatprep.subr.bf16.mxu1 %v4146_v51 }
 0x377   : > { %3784 = vmatmul.mubr.bf16.gmra.mrb[8].mxu1 %v4645_v6 }
 0x378   : > { %3787 = vmatprep.mubr.bf16.mxu1 %v4653_v8  ;;  %3816 = vmatpush3.bf16.msra.mxu1 %v4146_v51 }
 0x379   : > { %3817 = vmatprep.subr.bf16.mxu1 %v4147_v54 }
 0x37a   : > { %1999 = vmatmul.mubr.bf16.gmra.mrb[8].mxu0 %v4094_v23 }
 0x37b   : > { %2006 = vmatprep.mubr.bf16.mxu0 %v4095_v25 }
 0x37c   : > { %3818 = vmatpush3.bf16.msra.mxu1 %v4147_v54 }
 0x37d   : > { %3819 = vmatprep.subr.bf16.mxu1 %v4148_v57 }
 0x37f   : > { %3788 = vmatmul.mubr.bf16.gmra.mrb[12].mxu1 %v4663_v12 }
 0x380   : > { %3791 = vmatprep.mubr.bf16.mxu1 %v4604_v55  ;;  %3820 = vmatpush3.bf16.msra.mxu1 %v4148_v57 }
 0x381   : > { %3821 = vmatprep.subr.bf16.mxu1 %v4149_v13 }
 0x382   : > { %2007 = vmatmul.mubr.bf16.gmra.mrb[12].mxu0 %v4097_v29 }
 0x383   : > { %2014 = vmatprep.mubr.bf16.mxu0 %v4098_v31 }
 0x384   : > { %3822 = vmatpush3.bf16.msra.mxu1 %v4149_v13 }
 0x387   : > { %3792 = vmatmul.mubr.bf16.gmra.mrb[16].mxu1 %v4608_v60 }
 0x388   : > { %3795 = vmatprep.mubr.bf16.mxu1 %v4616_v62 }
 0x38a   : > { %2015 = vmatmul.mubr.bf16.gmra.mrb[16].mxu0 %v4100_v33 }
 0x38b   : > { %2022 = vmatprep.mubr.bf16.mxu0 %v4101_v35 }
 0x38f   : > { %3796 = vmatmul.mubr.bf16.gmra.mrb[20].mxu1 %v4624_v1 }
 0x390   : > { %3799 = vmatprep.mubr.bf16.mxu1 %v4632_v3 }
 0x392   : > { %2023 = vmatmul.mubr.bf16.gmra.mrb[20].mxu0 %v4103_v37 }
 0x393   : > { %2030 = vmatprep.mubr.bf16.mxu0 %v4104_v38 }
 0x397   : > { %3800 = vmatmul.mubr.bf16.gmra.mrb[24].mxu1 %v4640_v5 }
 0x398   : > { %3803 = vmatprep.mubr.bf16.mxu1 %v4648_v7 }
 0x39a   : > { %2031 = vmatmul.mubr.bf16.gmra.mrb[24].mxu0 %v4106_v39 }
 0x39b   : > { %2038 = vmatprep.mubr.bf16.mxu0 %v4107_v40 }
 0x39f   : > { %3804 = vmatmul.mubr.bf16.gmra.mrb[28].mxu1 %v4656_v9 }
 0x3a2   : > { %2039 = vmatmul.mubr.bf16.gmra.mrb[28].mxu0 %v4109_v43 }
 0x3a3   : > { %2046 = vmatprep.mubr.bf16.mxu0 %v4110_v44 }
 0x3aa   : > { %2047 = vmatmul.mubr.bf16.gmra.mrb[32].mxu0 %v4112_v45 }
 0x3ab   : > { %2054 = vmatprep.mubr.bf16.mxu0 %v4113_v46 }
 0x3b2   : > { %2055 = vmatmul.mubr.bf16.gmra.mrb[36].mxu0 %v4115_v47 }
 0x3b3   : > { %2062 = vmatprep.mubr.bf16.mxu0 %v4116_v48 }
 0x3ba   : > { %2063 = vmatmul.mubr.bf16.gmra.mrb[40].mxu0 %v4118_v49 }
 0x3bb   : > { %2070 = vmatprep.mubr.bf16.mxu0 %v4119_v50 }
 0x3c2   : > { %2071 = vmatmul.mubr.bf16.gmra.mrb[44].mxu0 %v4121_v52 }
 0x3c3   : > { %2078 = vmatprep.mubr.bf16.mxu0 %v4122_v53 }
 0x3ca   : > { %2079 = vmatmul.mubr.bf16.gmra.mrb[48].mxu0 %v4124_v58 }
 0x3cb   : > { %2086 = vmatprep.mubr.bf16.mxu0 %v4125_v0 }
 0x3d2   : > { %2087 = vmatmul.mubr.bf16.gmra.mrb[52].mxu0 %v4127_v14 }
 0x3d3   : > { %2094 = vmatprep.mubr.bf16.mxu0 %v4128_v27 }
 0x3da   : > { %2095 = vmatmul.mubr.bf16.gmra.mrb[56].mxu0 %v4130_v28 }
 0x3db   : > { %2102 = vmatprep.mubr.bf16.mxu0 %v4131_v59 }
 0x3e2   : > { %2103 = vmatmul.mubr.bf16.gmra.mrb[60].mxu0 %v4133_v42 }
 0x43d   : > { %v3479_v41 = vpop.f32.mrb[0].mxu0 }
 0x43e   : > { %v3480_v55 = vpop.f32.mrb[1].mxu0 }
 0x43f   : > { %v3481_v56 = vadd.f32 %v3480_v55, %v3479_v41  ;;  %v3482_v60 = vpop.f32.mrb[2].mxu0 }
 0x440   : > { %v3483_v61 = vpop.f32.mrb[3].mxu0 }
 0x441   : > { %v3484_v62 = vadd.f32 %v3483_v61, %v3482_v60 }
 0x443   : > { %v2111_v63 = vpack.c.bf16 %v3484_v62, %v3481_v56 }
 0x445   : > { %v3485_v1 = vpop.f32.mrb[4].mxu0  ;;  %3823 = vmatprep.mubr.bf16.mxu1 %v2111_v63 }
 0x446   : > { %v3486_v2 = vpop.f32.mrb[5].mxu0 }
 0x447   : > { %v3487_v3 = vadd.f32 %v3486_v2, %v3485_v1  ;;  %v3488_v4 = vpop.f32.mrb[6].mxu0 }
 0x448   : > { %v3489_v5 = vpop.f32.mrb[7].mxu0 }
 0x449   : > { %v3490_v6 = vadd.f32 %v3489_v5, %v3488_v4 }
 0x44b   : > { %v2112_v7 = vpack.c.bf16 %v3490_v6, %v3487_v3 }
 0x44d   : > { %v3491_v8 = vpop.f32.mrb[8].mxu0  ;;  %3824 = vmatmul.mubr.bf16.vlgmr.msra.gmra.mrb[0].mxu1 %v2112_v7 }
 0x44e   : > { %v3492_v9 = vpop.f32.mrb[9].mxu0 }
 0x44f   : > { %v3493_v10 = vadd.f32 %v3492_v9, %v3491_v8  ;;  %v3494_v11 = vpop.f32.mrb[10].mxu0 }
 0x450   : > { %v3495_v12 = vpop.f32.mrb[11].mxu0 }
 0x451   : > { %v3496_v15 = vadd.f32 %v3495_v12, %v3494_v11 }
 0x453   : > { %v2113_v16 = vpack.c.bf16 %v3496_v15, %v3493_v10 }
 0x455   : > { %v3497_v17 = vpop.f32.mrb[12].mxu0  ;;  %3827 = vmatprep.mubr.bf16.mxu1 %v2113_v16 }
 0x456   : > { %v3498_v18 = vpop.f32.mrb[13].mxu0 }
 0x457   : > { %v3499_v19 = vadd.f32 %v3498_v18, %v3497_v17  ;;  %v3500_v20 = vpop.f32.mrb[14].mxu0 }
 0x458   : > { %v3501_v21 = vpop.f32.mrb[15].mxu0 }
 0x459   : > { %v3502_v22 = vadd.f32 %v3501_v21, %v3500_v20 }
 0x45b   : > { %v2114_v23 = vpack.c.bf16 %v3502_v22, %v3499_v19 }
 0x45d   : > { %v3503_v24 = vpop.f32.mrb[16].mxu0  ;;  %3828 = vmatmul.mubr.bf16.gmra.mrb[4].mxu1 %v2114_v23 }
 0x45e   : > { %v3504_v25 = vpop.f32.mrb[17].mxu0 }
 0x45f   : > { %v3505_v26 = vadd.f32 %v3504_v25, %v3503_v24  ;;  %v3506_v29 = vpop.f32.mrb[18].mxu0 }
 0x460   : > { %v3507_v30 = vpop.f32.mrb[19].mxu0 }
 0x461   : > { %v3508_v31 = vadd.f32 %v3507_v30, %v3506_v29 }
 0x463   : > { %v2115_v32 = vpack.c.bf16 %v3508_v31, %v3505_v26 }
 0x465   : > { %v3509_v33 = vpop.f32.mrb[20].mxu0  ;;  %3831 = vmatprep.mubr.bf16.mxu1 %v2115_v32 }
 0x466   : > { %v3510_v34 = vpop.f32.mrb[21].mxu0 }
 0x467   : > { %v3511_v35 = vadd.f32 %v3510_v34, %v3509_v33  ;;  %v3512_v36 = vpop.f32.mrb[22].mxu0 }
 0x468   : > { %v3513_v37 = vpop.f32.mrb[23].mxu0 }
 0x469   : > { %v3514_v38 = vadd.f32 %v3513_v37, %v3512_v36 }
 0x46b   : > { %v2116_v39 = vpack.c.bf16 %v3514_v38, %v3511_v35 }
 0x46d   : > { %v3515_v40 = vpop.f32.mrb[24].mxu0  ;;  %3832 = vmatmul.mubr.bf16.gmra.mrb[8].mxu1 %v2116_v39 }
 0x46e   : > { %v3516_v43 = vpop.f32.mrb[25].mxu0 }
 0x46f   : > { %v3517_v44 = vadd.f32 %v3516_v43, %v3515_v40  ;;  %v3518_v45 = vpop.f32.mrb[26].mxu0 }
 0x470   : > { %v3519_v46 = vpop.f32.mrb[27].mxu0 }
 0x471   : > { %v3520_v47 = vadd.f32 %v3519_v46, %v3518_v45 }
 0x473   : > { %v2117_v48 = vpack.c.bf16 %v3520_v47, %v3517_v44 }
 0x475   : > { %v3521_v49 = vpop.f32.mrb[28].mxu0  ;;  %3835 = vmatprep.mubr.bf16.mxu1 %v2117_v48  ;;  %v4789_v48 = vld [vmem:[%s4278_s23] ss:$0 sm:$0xff]  ;;  %s4801_s23 = scalar_lea.vmem [#allocation2], %s3279_s28 }
 0x476   : > { %v3522_v50 = vpop.f32.mrb[29].mxu0 }
 0x477   : > { %v3523_v51 = vadd.f32 %v3522_v50, %v3521_v49  ;;  %v3524_v52 = vpop.f32.mrb[30].mxu0 }
 0x478   : > { %v3525_v53 = vpop.f32.mrb[31].mxu0 }
 0x479   : > { %v3526_v54 = vadd.f32 %v3525_v53, %v3524_v52 }
 0x47b   : > { %v2118_v57 = vpack.c.bf16 %v3526_v54, %v3523_v51 }
 0x47d   : > { %v3527_v58 = vpop.f32.mrb[32].mxu0  ;;  %3836 = vmatmul.mubr.bf16.gmra.mrb[12].mxu1 %v2118_v57 }
 0x47e   : > { %v3528_v0 = vpop.f32.mrb[33].mxu0 }
 0x47f   : > { %v3529_v13 = vadd.f32 %v3528_v0, %v3527_v58  ;;  %v3530_v14 = vpop.f32.mrb[34].mxu0 }
 0x480   : > { %v3531_v27 = vpop.f32.mrb[35].mxu0 }
 0x481   : > { %v3532_v28 = vadd.f32 %v3531_v27, %v3530_v14 }
 0x483   : > { %v2119_v59 = vpack.c.bf16 %v3532_v28, %v3529_v13 }
 0x485   : > { %v3533_v42 = vpop.f32.mrb[36].mxu0  ;;  %3839 = vmatprep.mubr.bf16.mxu1 %v2119_v59 }
 0x486   : > { %v3534_v41 = vpop.f32.mrb[37].mxu0 }
 0x487   : > { %v3535_v55 = vadd.f32 %v3534_v41, %v3533_v42  ;;  %v3536_v56 = vpop.f32.mrb[38].mxu0 }
 0x488   : > { %v3537_v60 = vpop.f32.mrb[39].mxu0 }
 0x489   : > { %v3538_v61 = vadd.f32 %v3537_v60, %v3536_v56 }
 0x48b   : > { %v2120_v62 = vpack.c.bf16 %v3538_v61, %v3535_v55 }
 0x48d   : > { %v3539_v63 = vpop.f32.mrb[40].mxu0  ;;  %3840 = vmatmul.mubr.bf16.gmra.mrb[16].mxu1 %v2120_v62 }
 0x48e   : > { %v3540_v1 = vpop.f32.mrb[41].mxu0 }
 0x48f   : > { %v3541_v2 = vadd.f32 %v3540_v1, %v3539_v63  ;;  %v3542_v3 = vpop.f32.mrb[42].mxu0 }
 0x490   : > { %v3543_v4 = vpop.f32.mrb[43].mxu0 }
 0x491   : > { %v3544_v5 = vadd.f32 %v3543_v4, %v3542_v3 }
 0x493   : > { %v2121_v6 = vpack.c.bf16 %v3544_v5, %v3541_v2 }
 0x495   : > { %v3545_v7 = vpop.f32.mrb[44].mxu0  ;;  %3843 = vmatprep.mubr.bf16.mxu1 %v2121_v6 }
 0x496   : > { %v3546_v8 = vpop.f32.mrb[45].mxu0 }
 0x497   : > { %v3547_v9 = vadd.f32 %v3546_v8, %v3545_v7  ;;  %v3548_v10 = vpop.f32.mrb[46].mxu0 }
 0x498   : > { %v3549_v11 = vpop.f32.mrb[47].mxu0 }
 0x499   : > { %v3550_v12 = vadd.f32 %v3549_v11, %v3548_v10 }
 0x49b   : > { %v2122_v15 = vpack.c.bf16 %v3550_v12, %v3547_v9 }
 0x49d   : > { %v3551_v16 = vpop.f32.mrb[48].mxu0  ;;  %3844 = vmatmul.mubr.bf16.gmra.mrb[20].mxu1 %v2122_v15 }
 0x49e   : > { %v3552_v17 = vpop.f32.mrb[49].mxu0 }
 0x49f   : > { %v3553_v18 = vadd.f32 %v3552_v17, %v3551_v16  ;;  %v3554_v19 = vpop.f32.mrb[50].mxu0 }
 0x4a0   : > { %v3555_v20 = vpop.f32.mrb[51].mxu0 }
 0x4a1   : > { %v3556_v21 = vadd.f32 %v3555_v20, %v3554_v19 }
 0x4a3   : > { %v2123_v22 = vpack.c.bf16 %v3556_v21, %v3553_v18 }
 0x4a5   : > { %v3557_v23 = vpop.f32.mrb[52].mxu0  ;;  %3847 = vmatprep.mubr.bf16.mxu1 %v2123_v22 }
 0x4a6   : > { %v3558_v24 = vpop.f32.mrb[53].mxu0 }
 0x4a7   : > { %v3559_v25 = vadd.f32 %v3558_v24, %v3557_v23  ;;  %v3560_v26 = vpop.f32.mrb[54].mxu0 }
 0x4a8   : > { %v3561_v29 = vpop.f32.mrb[55].mxu0 }
 0x4a9   : > { %v3562_v30 = vadd.f32 %v3561_v29, %v3560_v26 }
 0x4ab   : > { %v2124_v31 = vpack.c.bf16 %v3562_v30, %v3559_v25 }
 0x4ad   : > { %v3563_v32 = vpop.f32.mrb[56].mxu0  ;;  %3848 = vmatmul.mubr.bf16.gmra.mrb[24].mxu1 %v2124_v31 }
 0x4ae   : > { %v3564_v33 = vpop.f32.mrb[57].mxu0 }
 0x4af   : > { %v3565_v34 = vadd.f32 %v3564_v33, %v3563_v32  ;;  %v3566_v35 = vpop.f32.mrb[58].mxu0 }
 0x4b0   : > { %v3567_v36 = vpop.f32.mrb[59].mxu0 }
 0x4b1   : > { %v3568_v37 = vadd.f32 %v3567_v36, %v3566_v35 }
 0x4b3   : > { %v2125_v38 = vpack.c.bf16 %v3568_v37, %v3565_v34 }
 0x4b5   : > { %v3569_v39 = vpop.f32.mrb[60].mxu0  ;;  %3851 = vmatprep.mubr.bf16.mxu1 %v2125_v38 }
 0x4b6   : > { %v3570_v40 = vpop.f32.mrb[61].mxu0 }
 0x4b7   : > { %v3571_v43 = vadd.f32 %v3570_v40, %v3569_v39  ;;  %v3572_v44 = vpop.f32.mrb[62].mxu0 }
 0x4b8   : > { %v3573_v45 = vpop.f32.mrb[63].mxu0 }
 0x4b9   : > { %v3574_v46 = vadd.f32 %v3573_v45, %v3572_v44 }
 0x4bb   : > { %v2126_v47 = vpack.c.bf16 %v3574_v46, %v3571_v43 }
 0x4bd   : > { %3852 = vmatmul.mubr.bf16.gmra.mrb[28].mxu1 %v2126_v47 }
 0x520   : > { %v3825_v49 = vpop.f32.mrb[0].mxu1 }
 0x521   : > { %v2586_v50 = vadd.f32 %v3825_v49, %v4789_v48  ;;  %v2450_v51 = vpop.f32.mrb[1].mxu1 }
 0x522   : > { %v2584_v52 = vadd.f32 %v4789_v48, %v2450_v51  ;;  %v3826_v53 = vpop.f32.mrb[2].mxu1 }
 0x523   : > { %v2587_v54 = vadd.f32 %v3826_v53, %v4789_v48  ;;  %v2453_v57 = vpop.f32.mrb[3].mxu1  ;;  %v2618_v0 = vmax.f32 %v2586_v50, 0.0 }
 0x524   : > { %v2585_v58 = vadd.f32 %v4789_v48, %v2453_v57  ;;  %v2616_v14 = vmax.f32 %v2584_v52, 0.0 }
 0x525   : > { %v2619_v13 = vmax.f32 %v2587_v54, 0.0 }
 0x526   : > { %v2617_v27 = vmax.f32 %v2585_v58, 0.0 }
 0x527   : > { %v4797_v28 = vpack.c.bf16 %v2619_v13, %v2618_v0 }
 0x528   : > { %v4799_v59 = vpack.c.bf16 %v2617_v27, %v2616_v14 }
 0x529   : > { %2669 = vst [vmem:[%s4801_s23 + $0x8] sm:$0xff] %v4797_v28 }
 0x52a   : > { %2668 = vst [vmem:[%s4801_s23] sm:$0xff] %v4799_v59 }
 0x530   : > { %v3829_v42 = vpop.f32.mrb[4].mxu1 }
 0x531   : > { %v2590_v41 = vadd.f32 %v3829_v42, %v4789_v48  ;;  %v2466_v55 = vpop.f32.mrb[5].mxu1 }
 0x532   : > { %v2588_v56 = vadd.f32 %v4789_v48, %v2466_v55  ;;  %v3830_v60 = vpop.f32.mrb[6].mxu1 }
 0x533   : > { %v2591_v61 = vadd.f32 %v3830_v60, %v4789_v48  ;;  %v2469_v62 = vpop.f32.mrb[7].mxu1  ;;  %v2622_v1 = vmax.f32 %v2590_v41, 0.0 }
 0x534   : > { %v2589_v63 = vadd.f32 %v4789_v48, %v2469_v62  ;;  %v2620_v3 = vmax.f32 %v2588_v56, 0.0 }
 0x535   : > { %v2623_v2 = vmax.f32 %v2591_v61, 0.0 }
 0x536   : > { %v2621_v4 = vmax.f32 %v2589_v63, 0.0 }
 0x537   : > { %v4811_v5 = vpack.c.bf16 %v2623_v2, %v2622_v1 }
 0x538   : > { %v4813_v6 = vpack.c.bf16 %v2621_v4, %v2620_v3 }
 0x539   : > { %2671 = vst [vmem:[%s4801_s23 + $0x18] sm:$0xff] %v4811_v5 }
 0x53a   : > { %2670 = vst [vmem:[%s4801_s23 + $0x10] sm:$0xff] %v4813_v6 }
 0x540   : > { %v3833_v7 = vpop.f32.mrb[8].mxu1 }
 0x541   : > { %v2594_v8 = vadd.f32 %v3833_v7, %v4789_v48  ;;  %v2482_v9 = vpop.f32.mrb[9].mxu1 }
 0x542   : > { %v2592_v10 = vadd.f32 %v4789_v48, %v2482_v9  ;;  %v3834_v11 = vpop.f32.mrb[10].mxu1 }
 0x543   : > { %v2595_v12 = vadd.f32 %v3834_v11, %v4789_v48  ;;  %v2485_v15 = vpop.f32.mrb[11].mxu1  ;;  %v2626_v17 = vmax.f32 %v2594_v8, 0.0 }
 0x544   : > { %v2593_v16 = vadd.f32 %v4789_v48, %v2485_v15  ;;  %v2624_v19 = vmax.f32 %v2592_v10, 0.0 }
 0x545   : > { %v2627_v18 = vmax.f32 %v2595_v12, 0.0 }
 0x546   : > { %v2625_v20 = vmax.f32 %v2593_v16, 0.0 }
 0x547   : > { %v4823_v21 = vpack.c.bf16 %v2627_v18, %v2626_v17 }
 0x548   : > { %v4825_v22 = vpack.c.bf16 %v2625_v20, %v2624_v19 }
 0x549   : > { %2673 = vst [vmem:[%s4801_s23 + $0x28] sm:$0xff] %v4823_v21 }
 0x54a   : > { %2672 = vst [vmem:[%s4801_s23 + $0x20] sm:$0xff] %v4825_v22 }
 0x550   : > { %v3837_v23 = vpop.f32.mrb[12].mxu1 }
 0x551   : > { %v2598_v24 = vadd.f32 %v3837_v23, %v4789_v48  ;;  %v2498_v25 = vpop.f32.mrb[13].mxu1 }
 0x552   : > { %v2596_v26 = vadd.f32 %v4789_v48, %v2498_v25  ;;  %v3838_v29 = vpop.f32.mrb[14].mxu1 }
 0x553   : > { %v2599_v30 = vadd.f32 %v3838_v29, %v4789_v48  ;;  %v2501_v31 = vpop.f32.mrb[15].mxu1  ;;  %v2630_v33 = vmax.f32 %v2598_v24, 0.0 }
 0x554   : > { %v2597_v32 = vadd.f32 %v4789_v48, %v2501_v31  ;;  %v2628_v35 = vmax.f32 %v2596_v26, 0.0 }
 0x555   : > { %v2631_v34 = vmax.f32 %v2599_v30, 0.0 }
 0x556   : > { %v2629_v36 = vmax.f32 %v2597_v32, 0.0 }
 0x557   : > { %v4835_v37 = vpack.c.bf16 %v2631_v34, %v2630_v33 }
 0x558   : > { %v4837_v38 = vpack.c.bf16 %v2629_v36, %v2628_v35 }
 0x559   : > { %2675 = vst [vmem:[%s4801_s23 + $0x38] sm:$0xff] %v4835_v37 }
 0x55a   : > { %2674 = vst [vmem:[%s4801_s23 + $0x30] sm:$0xff] %v4837_v38 }
 0x560   : > { %v3841_v39 = vpop.f32.mrb[16].mxu1 }
 0x561   : > { %v2602_v40 = vadd.f32 %v3841_v39, %v4789_v48  ;;  %v2514_v43 = vpop.f32.mrb[17].mxu1 }
 0x562   : > { %v2600_v44 = vadd.f32 %v4789_v48, %v2514_v43  ;;  %v3842_v45 = vpop.f32.mrb[18].mxu1 }
 0x563   : > { %v2603_v46 = vadd.f32 %v3842_v45, %v4789_v48  ;;  %v2517_v47 = vpop.f32.mrb[19].mxu1  ;;  %v2634_v50 = vmax.f32 %v2602_v40, 0.0  ;;  %v4152_v40 = vld [vmem:[%s4957_s5 + $0x4] ss:$8 sps:$4 sm:$0xff] (!%p3250_p10)  }
 0x564   : > { %v2601_v49 = vadd.f32 %v4789_v48, %v2517_v47  ;;  %v2632_v52 = vmax.f32 %v2600_v44, 0.0  ;;  %2740 = vmatprep.mubr.bf16.mxu0 (!%p3250_p10), %v4152_v40 }
 0x565   : > { %v2635_v51 = vmax.f32 %v2603_v46, 0.0 }
 0x566   : > { %v2633_v53 = vmax.f32 %v2601_v49, 0.0 }
 0x567   : > { %v2657_v54 = vpack.c.bf16 %v2635_v51, %v2634_v50 }
 0x568   : > { %v2656_v57 = vpack.c.bf16 %v2633_v53, %v2632_v52 }
 0x569   : > { %2677 = vst [vmem:[%s4801_s23 + $0x48] sm:$0xff] %v2657_v54 }
 0x56a   : > { %2676 = vst [vmem:[%s4801_s23 + $0x40] sm:$0xff] %v2656_v57  ;;  %3623 = vmatprep.subr.bf16.mxu0 (!%p3250_p10), %v2656_v57 }
 0x56b   : > { %3624 = vmatpush3.bf16.msra.mxu0 (!%p3250_p10), %v4799_v59 }
 0x56c   : > { %3625 = vmatprep.subr.bf16.mxu0 (!%p3250_p10), %v2657_v54 }
 0x56f   : > { %3626 = vmatpush3.bf16.msra.mxu0 (!%p3250_p10), %v4797_v28 }
 0x570   : > { %v3845_v58 = vpop.f32.mrb[20].mxu1 }
 0x571   : > { %v2606_v0 = vadd.f32 %v3845_v58, %v4789_v48  ;;  %v2530_v13 = vpop.f32.mrb[21].mxu1 }
 0x572   : > { %v2604_v14 = vadd.f32 %v4789_v48, %v2530_v13  ;;  %v3846_v27 = vpop.f32.mrb[22].mxu1 }
 0x573   : > { %v2607_v42 = vadd.f32 %v3846_v27, %v4789_v48  ;;  %v2533_v41 = vpop.f32.mrb[23].mxu1  ;;  %v2638_v56 = vmax.f32 %v2606_v0, 0.0 }
 0x574   : > { %v2605_v55 = vadd.f32 %v4789_v48, %v2533_v41  ;;  %v2636_v61 = vmax.f32 %v2604_v14, 0.0 }
 0x575   : > { %v2639_v60 = vmax.f32 %v2607_v42, 0.0 }
 0x576   : > { %v2637_v62 = vmax.f32 %v2605_v55, 0.0 }
 0x577   : > { %v2659_v63 = vpack.c.bf16 %v2639_v60, %v2638_v56 }
 0x578   : > { %v2658_v1 = vpack.c.bf16 %v2637_v62, %v2636_v61 }
 0x579   : > { %2679 = vst [vmem:[%s4801_s23 + $0x58] sm:$0xff] %v2659_v63 }
 0x57a   : > { %2678 = vst [vmem:[%s4801_s23 + $0x50] sm:$0xff] %v2658_v1  ;;  %3627 = vmatprep.subr.bf16.mxu0 (!%p3250_p10), %v2658_v1 }
 0x57b   : > { %3628 = vmatpush3.bf16.msra.mxu0 (!%p3250_p10), %v4813_v6 }
 0x57c   : > { %3629 = vmatprep.subr.bf16.mxu0 (!%p3250_p10), %v2659_v63 }
 0x57f   : > { %3630 = vmatpush3.bf16.msra.mxu0 (!%p3250_p10), %v4811_v5 }
 0x580   : > { %v3849_v2 = vpop.f32.mrb[24].mxu1 }
 0x581   : > { %v2610_v3 = vadd.f32 %v3849_v2, %v4789_v48  ;;  %v2546_v4 = vpop.f32.mrb[25].mxu1 }
 0x582   : > { %v2608_v7 = vadd.f32 %v4789_v48, %v2546_v4  ;;  %v3850_v8 = vpop.f32.mrb[26].mxu1 }
 0x583   : > { %v2611_v9 = vadd.f32 %v3850_v8, %v4789_v48  ;;  %v2549_v10 = vpop.f32.mrb[27].mxu1  ;;  %v2642_v12 = vmax.f32 %v2610_v3, 0.0 }
 0x584   : > { %v2609_v11 = vadd.f32 %v4789_v48, %v2549_v10  ;;  %v2640_v16 = vmax.f32 %v2608_v7, 0.0 }
 0x585   : > { %v2643_v15 = vmax.f32 %v2611_v9, 0.0 }
 0x586   : > { %v2641_v17 = vmax.f32 %v2609_v11, 0.0 }
 0x587   : > { %v2661_v18 = vpack.c.bf16 %v2643_v15, %v2642_v12 }
 0x588   : > { %v2660_v19 = vpack.c.bf16 %v2641_v17, %v2640_v16 }
 0x589   : > { %2681 = vst [vmem:[%s4801_s23 + $0x68] sm:$0xff] %v2661_v18 }
 0x58a   : > { %2680 = vst [vmem:[%s4801_s23 + $0x60] sm:$0xff] %v2660_v19  ;;  %3631 = vmatprep.subr.bf16.mxu0 (!%p3250_p10), %v2660_v19 }
 0x58b   : > { %3632 = vmatpush3.bf16.msra.mxu0 (!%p3250_p10), %v4825_v22 }
 0x58c   : > { %3633 = vmatprep.subr.bf16.mxu0 (!%p3250_p10), %v2661_v18 }
 0x58f   : > { %3634 = vmatpush3.bf16.msra.mxu0 (!%p3250_p10), %v4823_v21 }
 0x590   : > { %v3853_v20 = vpop.f32.mrb[28].mxu1 }
 0x591   : > { %v2614_v23 = vadd.f32 %v3853_v20, %v4789_v48  ;;  %v2562_v24 = vpop.f32.mrb[29].mxu1 }
 0x592   : > { %v2612_v25 = vadd.f32 %v4789_v48, %v2562_v24  ;;  %v3854_v26 = vpop.f32.mrb[30].mxu1 }
 0x593   : > { %v2615_v29 = vadd.f32 %v3854_v26, %v4789_v48  ;;  %v2565_v30 = vpop.f32.mrb[31].mxu1  ;;  %v2646_v32 = vmax.f32 %v2614_v23, 0.0 }
 0x594   : > { %v2613_v31 = vadd.f32 %v4789_v48, %v2565_v30  ;;  %v2644_v34 = vmax.f32 %v2612_v25, 0.0  ;;  %2687 = sbr.rel (%p3250_p10) target bundleno = 1660 (0x67c), region = 80  ;;  %v4150_v48 = vld [vmem:[%s4957_s5] ss:$8 sps:$4 sm:$0xff] (!%p3250_p10)  }
 0x595   : > { %v2647_v33 = vmax.f32 %v2615_v29, 0.0 }
 0x596   : > { %v2645_v35 = vmax.f32 %v2613_v31, 0.0 }
 0x597   : > { %v2663_v36 = vpack.c.bf16 %v2647_v33, %v2646_v32 }
 0x598   : > { %v2662_v39 = vpack.c.bf16 %v2645_v35, %v2644_v34 }
 0x599   : > { %2683 = vst [vmem:[%s4801_s23 + $0x78] sm:$0xff] %v2663_v36 }
 0x59a   : > { %2682 = vst [vmem:[%s4801_s23 + $0x70] sm:$0xff] %v2662_v39  ;;  %3635 = vmatprep.subr.bf16.mxu0 (!%p3250_p10), %v2662_v39 }
 0x59b   : > { %3636 = vmatpush3.bf16.msra.mxu0 %v4837_v38 }
 0x59c   : > { %3637 = vmatprep.subr.bf16.mxu0 %v2663_v36 }
 0x59f   : > { %3638 = vmatpush3.bf16.msra.mxu0 %v4835_v37 }
 0x5a2   : > { %2741 = vmatmul.mubr.bf16.vlgmr.msra.gmra.mrb[0].mxu0 %v4150_v48 }
 0x675   : > { %v3639_v28 = vpop.f32.mrb[0].mxu0 }
 0x676   : > { %v3640_v59 = vpop.f32.mrb[1].mxu0 }
 0x677   : > { %v3641_v5 = vadd.f32 %v3640_v59, %v3639_v28  ;;  %v3642_v6 = vpop.f32.mrb[2].mxu0 }
 0x678   : > { %v3643_v43 = vpop.f32.mrb[3].mxu0 }
 0x679   : > { %v3644_v22 = vadd.f32 %v3643_v43, %v3642_v6  ;;  %2751 = vst [vmem:[#allocation3] sm:$0xff] %v3641_v5 }
 0x67b   : > { %2752 = vst [vmem:[#allocation3 + $0x8] sm:$0xff] %v3644_v22 }
 0x67c PF: > { %p2753_p11 = scmp.eq.s32.totalorder %s4183_s13, 2 }
 0x67d   : > { %v4153_v21 = vld [vmem:[%s4958_s6] sm:$0xff] (%p2753_p11)   ;;  %v4193_v38 = vmov (%p2753_p11), 0.0   ;;  %v4154_v37 = vld [vmem:[%s4958_s6 + $0x8] sm:$0xff] (%p2753_p11)   ;;  %vm4194_vm0 = vmmov (%p2753_p11), 0   ;;  %v4155_v44 = vld [vmem:[%s4958_s6 + $0x10] sm:$0xff] (%p2753_p11)  }
 0x67e   : > { %2758 = sbr.rel (!%p2753_p11) target bundleno = 2131 (0x853), region = 88  ;;  %3855 = vmatprep.subr.bf16.mxu0 (%p2753_p11), %v4193_v38  ;;  %3875 = vmatprep.subr.bf16.mxu1 (%p2753_p11), %v4193_v38  ;;  %v4161_v45 = vld [vmem:[%s4960_s8] sm:$0xff] (%p2753_p11)   ;;  %v4156_v46 = vld [vmem:[%s4958_s6 + $0x18] sm:$0xff] (%p2753_p11)   ;;  %v4162_v47 = vld [vmem:[%s4960_s8 + $0x8] sm:$0xff] (%p2753_p11)  }
 0x67f   : > { %3856 = vmatpush3.bf16.msra.mxu0 (%p2753_p11), %v4153_v21  ;;  %3871 = vmatprep.mubr.msk.bf16.mxu0 (%p2753_p11), %vm4194_vm0, %v4193_v38  ;;  %v4157_v49 = vld [vmem:[%s4958_s6 + $0x20] sm:$0xff] (%p2753_p11)   ;;  %v4163_v50 = vld [vmem:[%s4960_s8 + $0x10] sm:$0xff] (%p2753_p11)   ;;  %v4158_v51 = vld [vmem:[%s4958_s6 + $0x28] sm:$0xff] (%p2753_p11)  }
 0x680   : > { %3857 = vmatprep.subr.bf16.mxu0 (%p2753_p11), %v4193_v38  ;;  %3891 = vmatprep.mubr.msk.bf16.mxu1 (%p2753_p11), %vm4194_vm0, %v4193_v38  ;;  %v4164_v52 = vld [vmem:[%s4960_s8 + $0x18] sm:$0xff] (%p2753_p11)   ;;  %v4159_v53 = vld [vmem:[%s4958_s6 + $0x30] sm:$0xff] (%p2753_p11)   ;;  %v4165_v54 = vld [vmem:[%s4960_s8 + $0x20] sm:$0xff] (%p2753_p11)  }
 0x681   : > { %3876 = vmatpush3.bf16.msra.mxu1 (%p2753_p11), %v4161_v45  ;;  %v4160_v57 = vld [vmem:[%s4958_s6 + $0x38] sm:$0xff] (%p2753_p11)   ;;  %v2759_v58 = vld [vmem:[#allocation3] sm:$0xff] (%p2753_p11)  ;;  %v4166_v13 = vld [vmem:[%s4960_s8 + $0x28] sm:$0xff] (%p2753_p11)  }
 0x682   : > { %3877 = vmatprep.subr.bf16.mxu1 (%p2753_p11), %v4193_v38  ;;  %v2760_v0 = vld [vmem:[#allocation3 + $0x8] sm:$0xff] (%p2753_p11)  ;;  %v4167_v27 = vld [vmem:[%s4960_s8 + $0x30] sm:$0xff] (%p2753_p11)   ;;  %v4168_v42 = vld [vmem:[%s4960_s8 + $0x38] sm:$0xff] (%p2753_p11)  }
 0x683   : > { %3858 = vmatpush3.bf16.msra.mxu0 (%p2753_p11), %v4154_v37  ;;  %v2761_v14 = vpack.c.bf16 (%p2753_p11), %v2760_v0, %v2759_v58  ;;  %v3254_v41 = vld [vmem:[%s4959_s7] ss:$0 sm:$0xff] (%p2753_p11) }
 0x684   : > { %3859 = vmatprep.subr.bf16.mxu0 (%p2753_p11), %v4193_v38  ;;  %v3263_v4 = vld [vmem:[%s4961_s9] ss:$0 sm:$0xff] (%p2753_p11) }
 0x685   : > { %3878 = vmatpush3.bf16.msra.mxu1 %v4162_v47 }
 0x686   : > { %3879 = vmatprep.subr.bf16.mxu1 %v4193_v38 }
 0x687   : > { %3860 = vmatpush3.bf16.msra.mxu0 %v4155_v44 }
 0x688   : > { %3861 = vmatprep.subr.bf16.mxu0 %v4193_v38 }
 0x689   : > { %3880 = vmatpush3.bf16.msra.mxu1 %v4163_v50 }
 0x68a   : > { %3881 = vmatprep.subr.bf16.mxu1 %v4193_v38 }
 0x68b   : > { %3862 = vmatpush3.bf16.msra.mxu0 %v4156_v46 }
 0x68c   : > { %3863 = vmatprep.subr.bf16.mxu0 %v4193_v38 }
 0x68d   : > { %3882 = vmatpush3.bf16.msra.mxu1 %v4164_v52 }
 0x68e   : > { %3883 = vmatprep.subr.bf16.mxu1 %v4193_v38 }
 0x68f   : > { %3864 = vmatpush3.bf16.msra.mxu0 %v4157_v49 }
 0x690   : > { %3865 = vmatprep.subr.bf16.mxu0 %v4193_v38 }
 0x691   : > { %3884 = vmatpush3.bf16.msra.mxu1 %v4165_v54 }
 0x692   : > { %3885 = vmatprep.subr.bf16.mxu1 %v4193_v38 }
 0x693   : > { %3866 = vmatpush3.bf16.msra.mxu0 %v4158_v51 }
 0x694   : > { %3867 = vmatprep.subr.bf16.mxu0 %v4193_v38 }
 0x695   : > { %3886 = vmatpush3.bf16.msra.mxu1 %v4166_v13 }
 0x696   : > { %3887 = vmatprep.subr.bf16.mxu1 %v4193_v38 }
 0x697   : > { %3868 = vmatpush3.bf16.msra.mxu0 %v4159_v53 }
 0x698   : > { %3869 = vmatprep.subr.bf16.mxu0 %v4193_v38 }
 0x699   : > { %3888 = vmatpush3.bf16.msra.mxu1 %v4167_v27 }
 0x69a   : > { %3889 = vmatprep.subr.bf16.mxu1 %v4193_v38 }
 0x69b   : > { %3870 = vmatpush3.bf16.msra.mxu0 %v4160_v57 }
 0x69d   : > { %3890 = vmatpush3.bf16.msra.mxu1 %v4168_v42 }
 0x69e   : > { %3872 = vmatmul.mubr.bf16.vlgmr.msra.gmra.mrb[0].mxu0 %v2761_v14 }
 0x771   : > { %v2867_v55 = vpop.f32.mrb[0].mxu0 }
 0x772   : > { %v2868_v56 = vadd.f32 %v3254_v41, %v2867_v55  ;;  %v3873_v60 = vpop.f32.mrb[1].mxu0 }
 0x773   : > { %v2870_v61 = vpop.f32.mrb[2].mxu0 }
 0x774   : > { %v2871_v62 = vadd.f32 %v3254_v41, %v2870_v61  ;;  %v3874_v63 = vpop.f32.mrb[3].mxu0  ;;  %v2874_v1 = vmax.f32 %v2868_v56, 0.0 }
 0x776   : > { %v2875_v2 = vmax.f32 %v2871_v62, 0.0 }
 0x778   : > { %v2876_v3 = vpack.c.bf16 %v2875_v2, %v2874_v1 }
 0x77a   : > { %3892 = vmatmul.mubr.bf16.vlgmr.msra.gmra.mrb[0].mxu1 %v2876_v3 }
 0x84d   : > { %v2982_v7 = vpop.f32.mrb[0].mxu1 }
 0x84e   : > { %v2983_v8 = vadd.f32 %v3263_v4, %v2982_v7  ;;  %v3893_v9 = vpop.f32.mrb[1].mxu1 }
 0x84f   : > { %v2985_v10 = vpop.f32.mrb[2].mxu1 }
 0x850   : > { %2989 = vst [vmem:[%s4962_s10] sm:$0xff] %v2983_v8  ;;  %v2986_v11 = vadd.f32 %v3263_v4, %v2985_v10  ;;  %v3894_v12 = vpop.f32.mrb[3].mxu1 }
 0x852   : > { %2990 = vst [vmem:[%s4962_s10 + $0x8] sm:$0xff] %v2986_v11 }
 0x853 PF: > { %s20_s15 = sadd.s32 1, %s4191_s15   ;;  %s4963_s13 = smov %s4187_s14 }
 0x854   : > { %p17_p12 = scmp.ge.s32.totalorder %s20_s15, 5   ;;  %s4964_s14 = smov %s4966_s16 }
 0x856   :  { %19 = sbr.rel (!%p17_p12) target bundleno = 2 (0x2), region = 131 }

</bundles_post_ra>
